<compile_context>
chip_gen: v5e
topology: v5e:2x2
jax: 0.10.0
libtpu: 0.0.40
codegen_flags: <defaults>
</compile_context>

<pallas_src>
import jax
import jax.numpy as jnp
from jax.experimental import pallas as pl
from jax.experimental.pallas import tpu as pltpu


# ----------------------------------------------------------------------------
# Single fused kernel: all bi-LSTM layers + attention + decoder1/decoder2.
# ----------------------------------------------------------------------------
def _make_fused_kernel(num_layers, T, B, H):
    H2 = 2 * H          # fused hidden width  [fwd | bwd]
    G = 8 * H           # fused gate width    [i_f i_b | f_f f_b | g_f g_b | o_f o_b]

    def run_layer(xs, w_pair_ref, whh_ref, b_ref):
        # xs: (T, B, in) f32 value (kept in registers / VMEM temporaries).
        in_dim = xs.shape[-1]
        # Paired features [x[t] ‖ x[T-1-t]] -> one hoisted MXU matmul per layer
        # producing xp_fwd[t] + xp_bwd[T-1-t] (+ both biases) directly.
        xs_rev = jnp.stack([xs[T - 1 - t] for t in range(T)], axis=0)
        x_pair = jnp.concatenate([xs, xs_rev], axis=-1).reshape(T * B, 2 * in_dim)
        xp = (jnp.dot(x_pair.astype(jnp.bfloat16), w_pair_ref[...],
                      preferred_element_type=jnp.float32)
              + b_ref[...]).reshape(T, B, G)
        whh = whh_ref[...]                                   # (2H, 8H) bf16 block matrix

        h = jnp.zeros((B, H2), jnp.float32)                  # [h_fwd | h_bwd]
        c = jnp.zeros((B, H2), jnp.float32)
        hs = []
        for t in range(T):                                   # fully unrolled (tiny T)
            # fwd consumes time t, bwd consumes time T-1-t; one MXU push/step.
            gates = xp[t] + jnp.dot(h.astype(jnp.bfloat16), whh,
                                    preferred_element_type=jnp.float32)   # (B, 8H)
            i = jax.nn.sigmoid(gates[:, 0 * H2:1 * H2])
            f = jax.nn.sigmoid(gates[:, 1 * H2:2 * H2])
            g = jnp.tanh(gates[:, 2 * H2:3 * H2])
            o = jax.nn.sigmoid(gates[:, 3 * H2:4 * H2])
            c = f * c + i * g
            h = o * jnp.tanh(c)
            hs.append(h)
        # Reassemble the (T, B, 2H) sequence once, in registers (no per-step
        # masked stores, no scratch round trip).
        hf = jnp.stack([hs[t][:, :H] for t in range(T)], axis=0)           # fwd @ t
        hb = jnp.stack([hs[T - 1 - t][:, H:] for t in range(T)], axis=0)   # bwd @ t
        # TODO(synk): nn.LSTM inter-layer dropout is train-only; eval forward omits it.
        return jnp.concatenate([hf, hb], axis=-1)            # (T, B, 2H) f32

    def kernel(*refs):
        it = iter(refs)
        x_ref = next(it)
        layer_refs = [tuple(next(it) for _ in range(3)) for _ in range(num_layers)]
        wW_ref, wproj_ref, d1w_ref, d1b_ref, d2w_ref, d2b_ref = (next(it) for _ in range(6))
        out_ref = next(it)

        # ---- stacked bidirectional LSTM layers (sequence stays in registers) ----
        seq = run_layer(x_ref[...], *layer_refs[0])
        for l in range(1, num_layers):
            seq = run_layer(seq, *layer_refs[l])

        # ---- attention + decoders (fully batched, single output write) ----
        flat = seq.reshape(T * B, H2)
        u3 = jnp.tanh(jnp.dot(flat.astype(jnp.bfloat16), wW_ref[...],
                              preferred_element_type=jnp.float32)).reshape(T, B, H2)
        # (2H, 1) projection as a VPU multiply + lane reduction (no 1-lane MXU matmul).
        scores = jnp.sum(u3 * wproj_ref[...], axis=-1, keepdims=True)   # (T, B, 1)
        m = jnp.max(scores, axis=1, keepdims=True)
        e = jnp.exp(scores - m)
        att = e / jnp.sum(e, axis=1, keepdims=True)          # softmax over dim=1
        enc = jnp.sum(seq * att, axis=1)                     # (T, 2H)
        h1 = jnp.dot(enc.astype(jnp.bfloat16), d1w_ref[...],
                     preferred_element_type=jnp.float32) + d1b_ref[...]
        out = jnp.dot(h1.astype(jnp.bfloat16), d2w_ref[...],
                      preferred_element_type=jnp.float32) + d2b_ref[...]
        out_ref[...] = out

    return kernel


# ----------------------------------------------------------------------------
# Wrapper: embedding gather in XLA, everything else in ONE pallas_call.
# ----------------------------------------------------------------------------
def lstm_attention_forward(inputs, kp):
    x = jnp.take(kp['embedding'], inputs, axis=0)                # (N0, N1, E), time-major
    T, B, _ = x.shape
    H = kp['d1b'].shape[1]
    C = kp['d2b'].shape[1]
    L = len(kp['layers'])

    args = [x]
    for lyr in kp['layers']:
        args += [lyr['w_pair'], lyr['whh'], lyr['b']]
    args += [kp['weight_W'], kp['wproj_row'],
             kp['d1w_t'], kp['d1b'], kp['d2w_t'], kp['d2b']]

    # TODO(synk): for non-toy T/B, add a "parallel" grid axis over batch (and
    # split fwd/bwd over the two v7x TensorCores); one grid point is optimal here.
    return pl.pallas_call(
        _make_fused_kernel(L, T, B, H),
        out_shape=jax.ShapeDtypeStruct((T, C), jnp.float32),
        in_specs=[pl.BlockSpec(memory_space=pltpu.MemorySpace.VMEM)] * len(args),
        out_specs=pl.BlockSpec(memory_space=pltpu.MemorySpace.VMEM),
    )(*args)


# ----------------------------------------------------------------------------
# Deterministic raw parameters (shapes from the module __init__).
# ----------------------------------------------------------------------------
def init_params(key, vocab, E, H, num_layers, C):
    keys = iter(jax.random.split(key, 64))

    def u(k, shape, a):
        return jax.random.uniform(k, shape, jnp.float32, -a, a)

    p = {'embedding': jax.random.normal(next(keys), (vocab, E), jnp.float32) * 0.1}
    k_lstm = 1.0 / (H ** 0.5)
    layers = []
    for l in range(num_layers):
        in_sz = E if l == 0 else 2 * H
        layer = {}
        for d in ('fwd', 'bwd'):
            wih = u(next(keys), (4 * H, in_sz), k_lstm)   # PyTorch weight_ih_l{l}
            whh = u(next(keys), (4 * H, H), k_lstm)       # PyTorch weight_hh_l{l}
            bih = u(next(keys), (4 * H,), k_lstm)
            bhh = u(next(keys), (4 * H,), k_lstm)
            layer[d] = dict(wih_t=wih.T, whh_t=whh.T, b=(bih + bhh).reshape(1, 4 * H))
        layers.append(layer)
    p['lstm'] = layers
    p['weight_W'] = u(next(keys), (2 * H, 2 * H), 0.1)
    p['weight_proj'] = u(next(keys), (2 * H, 1), 0.1)
    kd1 = 1.0 / ((2 * H) ** 0.5)
    kd2 = 1.0 / (H ** 0.5)
    p['d1w_t'] = u(next(keys), (H, 2 * H), kd1).T
    p['d1b'] = u(next(keys), (H,), kd1).reshape(1, H)
    p['d2w_t'] = u(next(keys), (C, H), kd2).T
    p['d2b'] = u(next(keys), (C,), kd2).reshape(1, C)
    return p


# ----------------------------------------------------------------------------
# One-time (outside jit) weight preparation for the fused kernel.
# Gate column layout (8H): [i_f i_b | f_f f_b | g_f g_b | o_f o_b].
#   w_pair (2*in, 8H): top `in` rows = fwd wih into fwd slots, bottom `in` rows
#     = bwd wih into bwd slots, so [x[t] ‖ x[T-1-t]] @ w_pair gives both
#     directions' input projections already summed per time step.
#   whh (2H, 8H): block matrix so both directions share one MXU push per step.
# MXU-operand weights are pre-cast to bf16 (f32 accumulation in-kernel).
# ----------------------------------------------------------------------------
def _prepare_layer(fwd, bwd, H):
    in_dim = fwd['wih_t'].shape[0]
    zi = jnp.zeros((in_dim, H), jnp.float32)
    zh = jnp.zeros((H, H), jnp.float32)
    top_cols, bot_cols, whh_cols, b_cols = [], [], [], []
    for g in range(4):
        sl = slice(g * H, (g + 1) * H)
        top_cols += [fwd['wih_t'][:, sl], zi]
        bot_cols += [zi, bwd['wih_t'][:, sl]]
        whh_cols += [jnp.concatenate([fwd['whh_t'][:, sl], zh], axis=0),
                     jnp.concatenate([zh, bwd['whh_t'][:, sl]], axis=0)]
        b_cols += [fwd['b'][:, sl], bwd['b'][:, sl]]
    w_pair = jnp.concatenate([jnp.concatenate(top_cols, axis=1),
                              jnp.concatenate(bot_cols, axis=1)], axis=0)   # (2*in, 8H)
    return dict(w_pair=w_pair.astype(jnp.bfloat16),
                whh=jnp.concatenate(whh_cols, axis=1).astype(jnp.bfloat16),  # (2H, 8H)
                b=jnp.concatenate(b_cols, axis=1))                           # (1, 8H) f32


def prepare_kernel_params(p, H):
    return dict(
        embedding=p['embedding'],
        layers=[_prepare_layer(l['fwd'], l['bwd'], H) for l in p['lstm']],
        weight_W=p['weight_W'].astype(jnp.bfloat16),
        wproj_row=p['weight_proj'].reshape(1, 2 * H),        # f32 row vector (VPU mul+reduce)
        d1w_t=p['d1w_t'].astype(jnp.bfloat16), d1b=p['d1b'],
        d2w_t=p['d2w_t'].astype(jnp.bfloat16), d2b=p['d2b'])


# ----------------------------------------------------------------------------
# Pure-JAX f32 reference (same math, no Pallas) for a sanity check.
# ----------------------------------------------------------------------------
def _ref_lstm_dir(x, wih_t, whh_t, b):
    T, B, _ = x.shape
    H = whh_t.shape[0]
    h = jnp.zeros((B, H), jnp.float32)
    c = jnp.zeros((B, H), jnp.float32)
    ys = []
    for t in range(T):
        gates = x[t] @ wih_t + h @ whh_t + b
        i = jax.nn.sigmoid(gates[:, :H])
        f = jax.nn.sigmoid(gates[:, H:2 * H])
        g = jnp.tanh(gates[:, 2 * H:3 * H])
        o = jax.nn.sigmoid(gates[:, 3 * H:])
        c = f * c + i * g
        h = o * jnp.tanh(c)
        ys.append(h)
    return jnp.stack(ys, 0)


def reference_forward(inputs, params):
    seq = jnp.take(params['embedding'], inputs, axis=0)
    for layer in params['lstm']:
        f, b = layer['fwd'], layer['bwd']
        of = _ref_lstm_dir(seq, f['wih_t'], f['whh_t'], f['b'])
        ob = jnp.flip(_ref_lstm_dir(jnp.flip(seq, 0), b['wih_t'], b['whh_t'], b['b']), 0)
        seq = jnp.concatenate([of, ob], -1)
    u = jnp.tanh(seq @ params['weight_W'])
    att = jax.nn.softmax(u @ params['weight_proj'], axis=1)
    enc = jnp.sum(seq * att, axis=1)
    out = enc @ params['d1w_t'] + params['d1b']
    return out @ params['d2w_t'] + params['d2b']


if __name__ == "__main__":
    vocab_size, embedding_dim, hidden_dim, num_layers, n_class = 50, 32, 32, 2, 2
    N0, N1 = 4, 8   # `inputs` shape fed to the module (time, batch)

    key = jax.random.PRNGKey(0)
    params = init_params(key, vocab_size, embedding_dim, hidden_dim, num_layers, n_class)
    kparams = prepare_kernel_params(params, hidden_dim)
    inputs = jax.random.randint(jax.random.fold_in(key, 999), (N0, N1), 0,
                                vocab_size, dtype=jnp.int32)

    fwd = jax.jit(lstm_attention_forward)
    out = jax.block_until_ready(fwd(inputs, kparams))
    assert out.shape == (N0, n_class), out.shape

    ref = reference_forward(inputs, params)
    # bf16 MXU operands (f32 accumulate) vs. pure-f32 reference: accepted
    # precision tradeoff -> loosened tolerance.
    assert jnp.allclose(out, ref, rtol=2e-2, atol=2e-2), (out, ref)

    print("KERNEL_OK")
</pallas_src>

<mosaic_0001>
module attributes {stable_mosaic.version = 11 : i64} {
  func.func @kernel(%arg0: memref<4x8x32xf32, #tpu.memory_space<vmem>>, %arg1: memref<64x256xbf16, #tpu.memory_space<vmem>>, %arg2: memref<64x256xbf16, #tpu.memory_space<vmem>>, %arg3: memref<1x256xf32, #tpu.memory_space<vmem>>, %arg4: memref<128x256xbf16, #tpu.memory_space<vmem>>, %arg5: memref<64x256xbf16, #tpu.memory_space<vmem>>, %arg6: memref<1x256xf32, #tpu.memory_space<vmem>>, %arg7: memref<64x64xbf16, #tpu.memory_space<vmem>>, %arg8: memref<1x64xf32, #tpu.memory_space<vmem>>, %arg9: memref<64x32xbf16, #tpu.memory_space<vmem>>, %arg10: memref<1x32xf32, #tpu.memory_space<vmem>>, %arg11: memref<32x2xbf16, #tpu.memory_space<vmem>>, %arg12: memref<1x2xf32, #tpu.memory_space<vmem>>, %arg13: memref<4x2xf32, #tpu.memory_space<vmem>>) attributes {dimension_semantics = [], scalar_prefetch = 0 : i64, scratch_operands = 0 : i64, tpu.core_type = #tpu.core_type<tc>} {
    %c0 = arith.constant 0 : index
    %c0_0 = arith.constant 0 : index
    %c0_1 = arith.constant 0 : index
    %0 = vector.load %arg0[%c0, %c0_0, %c0_1] : memref<4x8x32xf32, #tpu.memory_space<vmem>>, vector<4x8x32xf32>
    %1 = vector.extract_strided_slice %0 {offsets = [3, 0, 0], sizes = [1, 8, 32], strides = [1, 1, 1]} : vector<4x8x32xf32> to vector<1x8x32xf32>
    %2 = vector.shape_cast %1 : vector<1x8x32xf32> to vector<8x32xf32>
    %3 = vector.extract_strided_slice %0 {offsets = [2, 0, 0], sizes = [1, 8, 32], strides = [1, 1, 1]} : vector<4x8x32xf32> to vector<1x8x32xf32>
    %4 = vector.shape_cast %3 : vector<1x8x32xf32> to vector<8x32xf32>
    %5 = vector.extract_strided_slice %0 {offsets = [1, 0, 0], sizes = [1, 8, 32], strides = [1, 1, 1]} : vector<4x8x32xf32> to vector<1x8x32xf32>
    %6 = vector.shape_cast %5 : vector<1x8x32xf32> to vector<8x32xf32>
    %7 = vector.extract_strided_slice %0 {offsets = [0, 0, 0], sizes = [1, 8, 32], strides = [1, 1, 1]} : vector<4x8x32xf32> to vector<1x8x32xf32>
    %8 = vector.shape_cast %7 : vector<1x8x32xf32> to vector<8x32xf32>
    %9 = vector.shape_cast %2 : vector<8x32xf32> to vector<1x8x32xf32>
    %10 = vector.shape_cast %4 : vector<8x32xf32> to vector<1x8x32xf32>
    %11 = vector.shape_cast %6 : vector<8x32xf32> to vector<1x8x32xf32>
    %12 = vector.shape_cast %8 : vector<8x32xf32> to vector<1x8x32xf32>
    %13 = tpu.concatenate %9, %10, %11, %12 in 0 : vector<1x8x32xf32>, vector<1x8x32xf32>, vector<1x8x32xf32>, vector<1x8x32xf32> -> vector<4x8x32xf32>
    %14 = tpu.concatenate %0, %13 in 2 : vector<4x8x32xf32>, vector<4x8x32xf32> -> vector<4x8x64xf32>
    %15 = vector.shape_cast %14 : vector<4x8x64xf32> to vector<32x64xf32>
    %16 = arith.truncf %15 : vector<32x64xf32> to vector<32x64xbf16>
    %c0_2 = arith.constant 0 : index
    %c0_3 = arith.constant 0 : index
    %17 = vector.load %arg1[%c0_2, %c0_3] : memref<64x256xbf16, #tpu.memory_space<vmem>>, vector<64x256xbf16>
    %cst = arith.constant dense<0.000000e+00> : vector<32x256xf32>
    %18 = tpu.matmul %16, %17, %cst {dimension_numbers = #tpu.dot_dimension_numbers<[1], [0], [0], [1], [0, 0, 1, 1], [], []>} : vector<32x64xbf16>, vector<64x256xbf16>, vector<32x256xf32> -> vector<32x256xf32>
    %c0_4 = arith.constant 0 : index
    %c0_5 = arith.constant 0 : index
    %19 = vector.load %arg3[%c0_4, %c0_5] : memref<1x256xf32, #tpu.memory_space<vmem>>, vector<1x256xf32>
    %20 = vector.broadcast %19 : vector<1x256xf32> to vector<32x256xf32>
    %21 = arith.addf %18, %20 : vector<32x256xf32>
    %22 = vector.shape_cast %21 : vector<32x256xf32> to vector<4x8x256xf32>
    %c0_6 = arith.constant 0 : index
    %c0_7 = arith.constant 0 : index
    %23 = vector.load %arg2[%c0_6, %c0_7] : memref<64x256xbf16, #tpu.memory_space<vmem>>, vector<64x256xbf16>
    %cst_8 = arith.constant 0.000000e+00 : f32
    %24 = vector.broadcast %cst_8 : f32 to vector<8x64xf32>
    %cst_9 = arith.constant 0.000000e+00 : f32
    %25 = vector.broadcast %cst_9 : f32 to vector<8x64xf32>
    %26 = vector.extract_strided_slice %22 {offsets = [0, 0, 0], sizes = [1, 8, 256], strides = [1, 1, 1]} : vector<4x8x256xf32> to vector<1x8x256xf32>
    %27 = vector.shape_cast %26 : vector<1x8x256xf32> to vector<8x256xf32>
    %28 = arith.truncf %24 : vector<8x64xf32> to vector<8x64xbf16>
    %cst_10 = arith.constant dense<0.000000e+00> : vector<8x256xf32>
    %29 = tpu.matmul %28, %23, %cst_10 {dimension_numbers = #tpu.dot_dimension_numbers<[1], [0], [0], [1], [0, 0, 1, 1], [], []>} : vector<8x64xbf16>, vector<64x256xbf16>, vector<8x256xf32> -> vector<8x256xf32>
    %30 = arith.addf %27, %29 : vector<8x256xf32>
    %31 = vector.extract_strided_slice %30 {offsets = [0, 0], sizes = [8, 64], strides = [1, 1]} : vector<8x256xf32> to vector<8x64xf32>
    %32 = arith.negf %31 : vector<8x64xf32>
    %33 = math.exp %32 : vector<8x64xf32>
    %cst_11 = arith.constant 1.000000e+00 : f32
    %34 = vector.broadcast %cst_11 : f32 to vector<8x64xf32>
    %35 = arith.addf %34, %33 : vector<8x64xf32>
    %36 = arith.divf %34, %35 : vector<8x64xf32>
    %37 = vector.extract_strided_slice %30 {offsets = [0, 64], sizes = [8, 64], strides = [1, 1]} : vector<8x256xf32> to vector<8x64xf32>
    %38 = arith.negf %37 : vector<8x64xf32>
    %39 = math.exp %38 : vector<8x64xf32>
    %cst_12 = arith.constant 1.000000e+00 : f32
    %40 = vector.broadcast %cst_12 : f32 to vector<8x64xf32>
    %41 = arith.addf %40, %39 : vector<8x64xf32>
    %42 = arith.divf %40, %41 : vector<8x64xf32>
    %43 = vector.extract_strided_slice %30 {offsets = [0, 128], sizes = [8, 64], strides = [1, 1]} : vector<8x256xf32> to vector<8x64xf32>
    %44 = math.tanh %43 : vector<8x64xf32>
    %45 = vector.extract_strided_slice %30 {offsets = [0, 192], sizes = [8, 64], strides = [1, 1]} : vector<8x256xf32> to vector<8x64xf32>
    %46 = arith.negf %45 : vector<8x64xf32>
    %47 = math.exp %46 : vector<8x64xf32>
    %cst_13 = arith.constant 1.000000e+00 : f32
    %48 = vector.broadcast %cst_13 : f32 to vector<8x64xf32>
    %49 = arith.addf %48, %47 : vector<8x64xf32>
    %50 = arith.divf %48, %49 : vector<8x64xf32>
    %51 = arith.mulf %42, %25 : vector<8x64xf32>
    %52 = arith.mulf %36, %44 : vector<8x64xf32>
    %53 = arith.addf %51, %52 : vector<8x64xf32>
    %54 = math.tanh %53 : vector<8x64xf32>
    %55 = arith.mulf %50, %54 : vector<8x64xf32>
    %56 = vector.extract_strided_slice %22 {offsets = [1, 0, 0], sizes = [1, 8, 256], strides = [1, 1, 1]} : vector<4x8x256xf32> to vector<1x8x256xf32>
    %57 = vector.shape_cast %56 : vector<1x8x256xf32> to vector<8x256xf32>
    %58 = arith.truncf %55 : vector<8x64xf32> to vector<8x64xbf16>
    %cst_14 = arith.constant dense<0.000000e+00> : vector<8x256xf32>
    %59 = tpu.matmul %58, %23, %cst_14 {dimension_numbers = #tpu.dot_dimension_numbers<[1], [0], [0], [1], [0, 0, 1, 1], [], []>} : vector<8x64xbf16>, vector<64x256xbf16>, vector<8x256xf32> -> vector<8x256xf32>
    %60 = arith.addf %57, %59 : vector<8x256xf32>
    %61 = vector.extract_strided_slice %60 {offsets = [0, 0], sizes = [8, 64], strides = [1, 1]} : vector<8x256xf32> to vector<8x64xf32>
    %62 = arith.negf %61 : vector<8x64xf32>
    %63 = math.exp %62 : vector<8x64xf32>
    %cst_15 = arith.constant 1.000000e+00 : f32
    %64 = vector.broadcast %cst_15 : f32 to vector<8x64xf32>
    %65 = arith.addf %64, %63 : vector<8x64xf32>
    %66 = arith.divf %64, %65 : vector<8x64xf32>
    %67 = vector.extract_strided_slice %60 {offsets = [0, 64], sizes = [8, 64], strides = [1, 1]} : vector<8x256xf32> to vector<8x64xf32>
    %68 = arith.negf %67 : vector<8x64xf32>
    %69 = math.exp %68 : vector<8x64xf32>
    %cst_16 = arith.constant 1.000000e+00 : f32
    %70 = vector.broadcast %cst_16 : f32 to vector<8x64xf32>
    %71 = arith.addf %70, %69 : vector<8x64xf32>
    %72 = arith.divf %70, %71 : vector<8x64xf32>
    %73 = vector.extract_strided_slice %60 {offsets = [0, 128], sizes = [8, 64], strides = [1, 1]} : vector<8x256xf32> to vector<8x64xf32>
    %74 = math.tanh %73 : vector<8x64xf32>
    %75 = vector.extract_strided_slice %60 {offsets = [0, 192], sizes = [8, 64], strides = [1, 1]} : vector<8x256xf32> to vector<8x64xf32>
    %76 = arith.negf %75 : vector<8x64xf32>
    %77 = math.exp %76 : vector<8x64xf32>
    %cst_17 = arith.constant 1.000000e+00 : f32
    %78 = vector.broadcast %cst_17 : f32 to vector<8x64xf32>
    %79 = arith.addf %78, %77 : vector<8x64xf32>
    %80 = arith.divf %78, %79 : vector<8x64xf32>
    %81 = arith.mulf %72, %53 : vector<8x64xf32>
    %82 = arith.mulf %66, %74 : vector<8x64xf32>
    %83 = arith.addf %81, %82 : vector<8x64xf32>
    %84 = math.tanh %83 : vector<8x64xf32>
    %85 = arith.mulf %80, %84 : vector<8x64xf32>
    %86 = vector.extract_strided_slice %22 {offsets = [2, 0, 0], sizes = [1, 8, 256], strides = [1, 1, 1]} : vector<4x8x256xf32> to vector<1x8x256xf32>
    %87 = vector.shape_cast %86 : vector<1x8x256xf32> to vector<8x256xf32>
    %88 = arith.truncf %85 : vector<8x64xf32> to vector<8x64xbf16>
    %cst_18 = arith.constant dense<0.000000e+00> : vector<8x256xf32>
    %89 = tpu.matmul %88, %23, %cst_18 {dimension_numbers = #tpu.dot_dimension_numbers<[1], [0], [0], [1], [0, 0, 1, 1], [], []>} : vector<8x64xbf16>, vector<64x256xbf16>, vector<8x256xf32> -> vector<8x256xf32>
    %90 = arith.addf %87, %89 : vector<8x256xf32>
    %91 = vector.extract_strided_slice %90 {offsets = [0, 0], sizes = [8, 64], strides = [1, 1]} : vector<8x256xf32> to vector<8x64xf32>
    %92 = arith.negf %91 : vector<8x64xf32>
    %93 = math.exp %92 : vector<8x64xf32>
    %cst_19 = arith.constant 1.000000e+00 : f32
    %94 = vector.broadcast %cst_19 : f32 to vector<8x64xf32>
    %95 = arith.addf %94, %93 : vector<8x64xf32>
    %96 = arith.divf %94, %95 : vector<8x64xf32>
    %97 = vector.extract_strided_slice %90 {offsets = [0, 64], sizes = [8, 64], strides = [1, 1]} : vector<8x256xf32> to vector<8x64xf32>
    %98 = arith.negf %97 : vector<8x64xf32>
    %99 = math.exp %98 : vector<8x64xf32>
    %cst_20 = arith.constant 1.000000e+00 : f32
    %100 = vector.broadcast %cst_20 : f32 to vector<8x64xf32>
    %101 = arith.addf %100, %99 : vector<8x64xf32>
    %102 = arith.divf %100, %101 : vector<8x64xf32>
    %103 = vector.extract_strided_slice %90 {offsets = [0, 128], sizes = [8, 64], strides = [1, 1]} : vector<8x256xf32> to vector<8x64xf32>
    %104 = math.tanh %103 : vector<8x64xf32>
    %105 = vector.extract_strided_slice %90 {offsets = [0, 192], sizes = [8, 64], strides = [1, 1]} : vector<8x256xf32> to vector<8x64xf32>
    %106 = arith.negf %105 : vector<8x64xf32>
    %107 = math.exp %106 : vector<8x64xf32>
    %cst_21 = arith.constant 1.000000e+00 : f32
    %108 = vector.broadcast %cst_21 : f32 to vector<8x64xf32>
    %109 = arith.addf %108, %107 : vector<8x64xf32>
    %110 = arith.divf %108, %109 : vector<8x64xf32>
    %111 = arith.mulf %102, %83 : vector<8x64xf32>
    %112 = arith.mulf %96, %104 : vector<8x64xf32>
    %113 = arith.addf %111, %112 : vector<8x64xf32>
    %114 = math.tanh %113 : vector<8x64xf32>
    %115 = arith.mulf %110, %114 : vector<8x64xf32>
    %116 = vector.extract_strided_slice %22 {offsets = [3, 0, 0], sizes = [1, 8, 256], strides = [1, 1, 1]} : vector<4x8x256xf32> to vector<1x8x256xf32>
    %117 = vector.shape_cast %116 : vector<1x8x256xf32> to vector<8x256xf32>
    %118 = arith.truncf %115 : vector<8x64xf32> to vector<8x64xbf16>
    %cst_22 = arith.constant dense<0.000000e+00> : vector<8x256xf32>
    %119 = tpu.matmul %118, %23, %cst_22 {dimension_numbers = #tpu.dot_dimension_numbers<[1], [0], [0], [1], [0, 0, 1, 1], [], []>} : vector<8x64xbf16>, vector<64x256xbf16>, vector<8x256xf32> -> vector<8x256xf32>
    %120 = arith.addf %117, %119 : vector<8x256xf32>
    %121 = vector.extract_strided_slice %120 {offsets = [0, 0], sizes = [8, 64], strides = [1, 1]} : vector<8x256xf32> to vector<8x64xf32>
    %122 = arith.negf %121 : vector<8x64xf32>
    %123 = math.exp %122 : vector<8x64xf32>
    %cst_23 = arith.constant 1.000000e+00 : f32
    %124 = vector.broadcast %cst_23 : f32 to vector<8x64xf32>
    %125 = arith.addf %124, %123 : vector<8x64xf32>
    %126 = arith.divf %124, %125 : vector<8x64xf32>
    %127 = vector.extract_strided_slice %120 {offsets = [0, 64], sizes = [8, 64], strides = [1, 1]} : vector<8x256xf32> to vector<8x64xf32>
    %128 = arith.negf %127 : vector<8x64xf32>
    %129 = math.exp %128 : vector<8x64xf32>
    %cst_24 = arith.constant 1.000000e+00 : f32
    %130 = vector.broadcast %cst_24 : f32 to vector<8x64xf32>
    %131 = arith.addf %130, %129 : vector<8x64xf32>
    %132 = arith.divf %130, %131 : vector<8x64xf32>
    %133 = vector.extract_strided_slice %120 {offsets = [0, 128], sizes = [8, 64], strides = [1, 1]} : vector<8x256xf32> to vector<8x64xf32>
    %134 = math.tanh %133 : vector<8x64xf32>
    %135 = vector.extract_strided_slice %120 {offsets = [0, 192], sizes = [8, 64], strides = [1, 1]} : vector<8x256xf32> to vector<8x64xf32>
    %136 = arith.negf %135 : vector<8x64xf32>
    %137 = math.exp %136 : vector<8x64xf32>
    %cst_25 = arith.constant 1.000000e+00 : f32
    %138 = vector.broadcast %cst_25 : f32 to vector<8x64xf32>
    %139 = arith.addf %138, %137 : vector<8x64xf32>
    %140 = arith.divf %138, %139 : vector<8x64xf32>
    %141 = arith.mulf %132, %113 : vector<8x64xf32>
    %142 = arith.mulf %126, %134 : vector<8x64xf32>
    %143 = arith.addf %141, %142 : vector<8x64xf32>
    %144 = math.tanh %143 : vector<8x64xf32>
    %145 = arith.mulf %140, %144 : vector<8x64xf32>
    %146 = vector.extract_strided_slice %55 {offsets = [0, 0], sizes = [8, 32], strides = [1, 1]} : vector<8x64xf32> to vector<8x32xf32>
    %147 = vector.extract_strided_slice %85 {offsets = [0, 0], sizes = [8, 32], strides = [1, 1]} : vector<8x64xf32> to vector<8x32xf32>
    %148 = vector.extract_strided_slice %115 {offsets = [0, 0], sizes = [8, 32], strides = [1, 1]} : vector<8x64xf32> to vector<8x32xf32>
    %149 = vector.extract_strided_slice %145 {offsets = [0, 0], sizes = [8, 32], strides = [1, 1]} : vector<8x64xf32> to vector<8x32xf32>
    %150 = vector.shape_cast %146 : vector<8x32xf32> to vector<1x8x32xf32>
    %151 = vector.shape_cast %147 : vector<8x32xf32> to vector<1x8x32xf32>
    %152 = vector.shape_cast %148 : vector<8x32xf32> to vector<1x8x32xf32>
    %153 = vector.shape_cast %149 : vector<8x32xf32> to vector<1x8x32xf32>
    %154 = tpu.concatenate %150, %151, %152, %153 in 0 : vector<1x8x32xf32>, vector<1x8x32xf32>, vector<1x8x32xf32>, vector<1x8x32xf32> -> vector<4x8x32xf32>
    %155 = vector.extract_strided_slice %145 {offsets = [0, 32], sizes = [8, 32], strides = [1, 1]} : vector<8x64xf32> to vector<8x32xf32>
    %156 = vector.extract_strided_slice %115 {offsets = [0, 32], sizes = [8, 32], strides = [1, 1]} : vector<8x64xf32> to vector<8x32xf32>
    %157 = vector.extract_strided_slice %85 {offsets = [0, 32], sizes = [8, 32], strides = [1, 1]} : vector<8x64xf32> to vector<8x32xf32>
    %158 = vector.extract_strided_slice %55 {offsets = [0, 32], sizes = [8, 32], strides = [1, 1]} : vector<8x64xf32> to vector<8x32xf32>
    %159 = vector.shape_cast %155 : vector<8x32xf32> to vector<1x8x32xf32>
    %160 = vector.shape_cast %156 : vector<8x32xf32> to vector<1x8x32xf32>
    %161 = vector.shape_cast %157 : vector<8x32xf32> to vector<1x8x32xf32>
    %162 = vector.shape_cast %158 : vector<8x32xf32> to vector<1x8x32xf32>
    %163 = tpu.concatenate %159, %160, %161, %162 in 0 : vector<1x8x32xf32>, vector<1x8x32xf32>, vector<1x8x32xf32>, vector<1x8x32xf32> -> vector<4x8x32xf32>
    %164 = tpu.concatenate %154, %163 in 2 : vector<4x8x32xf32>, vector<4x8x32xf32> -> vector<4x8x64xf32>
    %165 = vector.extract_strided_slice %164 {offsets = [3, 0, 0], sizes = [1, 8, 64], strides = [1, 1, 1]} : vector<4x8x64xf32> to vector<1x8x64xf32>
    %166 = vector.shape_cast %165 : vector<1x8x64xf32> to vector<8x64xf32>
    %167 = vector.extract_strided_slice %164 {offsets = [2, 0, 0], sizes = [1, 8, 64], strides = [1, 1, 1]} : vector<4x8x64xf32> to vector<1x8x64xf32>
    %168 = vector.shape_cast %167 : vector<1x8x64xf32> to vector<8x64xf32>
    %169 = vector.extract_strided_slice %164 {offsets = [1, 0, 0], sizes = [1, 8, 64], strides = [1, 1, 1]} : vector<4x8x64xf32> to vector<1x8x64xf32>
    %170 = vector.shape_cast %169 : vector<1x8x64xf32> to vector<8x64xf32>
    %171 = vector.extract_strided_slice %164 {offsets = [0, 0, 0], sizes = [1, 8, 64], strides = [1, 1, 1]} : vector<4x8x64xf32> to vector<1x8x64xf32>
    %172 = vector.shape_cast %171 : vector<1x8x64xf32> to vector<8x64xf32>
    %173 = vector.shape_cast %166 : vector<8x64xf32> to vector<1x8x64xf32>
    %174 = vector.shape_cast %168 : vector<8x64xf32> to vector<1x8x64xf32>
    %175 = vector.shape_cast %170 : vector<8x64xf32> to vector<1x8x64xf32>
    %176 = vector.shape_cast %172 : vector<8x64xf32> to vector<1x8x64xf32>
    %177 = tpu.concatenate %173, %174, %175, %176 in 0 : vector<1x8x64xf32>, vector<1x8x64xf32>, vector<1x8x64xf32>, vector<1x8x64xf32> -> vector<4x8x64xf32>
    %178 = tpu.concatenate %164, %177 in 2 : vector<4x8x64xf32>, vector<4x8x64xf32> -> vector<4x8x128xf32>
    %179 = vector.shape_cast %178 : vector<4x8x128xf32> to vector<32x128xf32>
    %180 = arith.truncf %179 : vector<32x128xf32> to vector<32x128xbf16>
    %c0_26 = arith.constant 0 : index
    %c0_27 = arith.constant 0 : index
    %181 = vector.load %arg4[%c0_26, %c0_27] : memref<128x256xbf16, #tpu.memory_space<vmem>>, vector<128x256xbf16>
    %cst_28 = arith.constant dense<0.000000e+00> : vector<32x256xf32>
    %182 = tpu.matmul %180, %181, %cst_28 {dimension_numbers = #tpu.dot_dimension_numbers<[1], [0], [0], [1], [0, 0, 1, 1], [], []>} : vector<32x128xbf16>, vector<128x256xbf16>, vector<32x256xf32> -> vector<32x256xf32>
    %c0_29 = arith.constant 0 : index
    %c0_30 = arith.constant 0 : index
    %183 = vector.load %arg6[%c0_29, %c0_30] : memref<1x256xf32, #tpu.memory_space<vmem>>, vector<1x256xf32>
    %184 = vector.broadcast %183 : vector<1x256xf32> to vector<32x256xf32>
    %185 = arith.addf %182, %184 : vector<32x256xf32>
    %186 = vector.shape_cast %185 : vector<32x256xf32> to vector<4x8x256xf32>
    %c0_31 = arith.constant 0 : index
    %c0_32 = arith.constant 0 : index
    %187 = vector.load %arg5[%c0_31, %c0_32] : memref<64x256xbf16, #tpu.memory_space<vmem>>, vector<64x256xbf16>
    %cst_33 = arith.constant 0.000000e+00 : f32
    %188 = vector.broadcast %cst_33 : f32 to vector<8x64xf32>
    %cst_34 = arith.constant 0.000000e+00 : f32
    %189 = vector.broadcast %cst_34 : f32 to vector<8x64xf32>
    %190 = vector.extract_strided_slice %186 {offsets = [0, 0, 0], sizes = [1, 8, 256], strides = [1, 1, 1]} : vector<4x8x256xf32> to vector<1x8x256xf32>
    %191 = vector.shape_cast %190 : vector<1x8x256xf32> to vector<8x256xf32>
    %192 = arith.truncf %188 : vector<8x64xf32> to vector<8x64xbf16>
    %cst_35 = arith.constant dense<0.000000e+00> : vector<8x256xf32>
    %193 = tpu.matmul %192, %187, %cst_35 {dimension_numbers = #tpu.dot_dimension_numbers<[1], [0], [0], [1], [0, 0, 1, 1], [], []>} : vector<8x64xbf16>, vector<64x256xbf16>, vector<8x256xf32> -> vector<8x256xf32>
    %194 = arith.addf %191, %193 : vector<8x256xf32>
    %195 = vector.extract_strided_slice %194 {offsets = [0, 0], sizes = [8, 64], strides = [1, 1]} : vector<8x256xf32> to vector<8x64xf32>
    %196 = arith.negf %195 : vector<8x64xf32>
    %197 = math.exp %196 : vector<8x64xf32>
    %cst_36 = arith.constant 1.000000e+00 : f32
    %198 = vector.broadcast %cst_36 : f32 to vector<8x64xf32>
    %199 = arith.addf %198, %197 : vector<8x64xf32>
    %200 = arith.divf %198, %199 : vector<8x64xf32>
    %201 = vector.extract_strided_slice %194 {offsets = [0, 64], sizes = [8, 64], strides = [1, 1]} : vector<8x256xf32> to vector<8x64xf32>
    %202 = arith.negf %201 : vector<8x64xf32>
    %203 = math.exp %202 : vector<8x64xf32>
    %cst_37 = arith.constant 1.000000e+00 : f32
    %204 = vector.broadcast %cst_37 : f32 to vector<8x64xf32>
    %205 = arith.addf %204, %203 : vector<8x64xf32>
    %206 = arith.divf %204, %205 : vector<8x64xf32>
    %207 = vector.extract_strided_slice %194 {offsets = [0, 128], sizes = [8, 64], strides = [1, 1]} : vector<8x256xf32> to vector<8x64xf32>
    %208 = math.tanh %207 : vector<8x64xf32>
    %209 = vector.extract_strided_slice %194 {offsets = [0, 192], sizes = [8, 64], strides = [1, 1]} : vector<8x256xf32> to vector<8x64xf32>
    %210 = arith.negf %209 : vector<8x64xf32>
    %211 = math.exp %210 : vector<8x64xf32>
    %cst_38 = arith.constant 1.000000e+00 : f32
    %212 = vector.broadcast %cst_38 : f32 to vector<8x64xf32>
    %213 = arith.addf %212, %211 : vector<8x64xf32>
    %214 = arith.divf %212, %213 : vector<8x64xf32>
    %215 = arith.mulf %206, %189 : vector<8x64xf32>
    %216 = arith.mulf %200, %208 : vector<8x64xf32>
    %217 = arith.addf %215, %216 : vector<8x64xf32>
    %218 = math.tanh %217 : vector<8x64xf32>
    %219 = arith.mulf %214, %218 : vector<8x64xf32>
    %220 = vector.extract_strided_slice %186 {offsets = [1, 0, 0], sizes = [1, 8, 256], strides = [1, 1, 1]} : vector<4x8x256xf32> to vector<1x8x256xf32>
    %221 = vector.shape_cast %220 : vector<1x8x256xf32> to vector<8x256xf32>
    %222 = arith.truncf %219 : vector<8x64xf32> to vector<8x64xbf16>
    %cst_39 = arith.constant dense<0.000000e+00> : vector<8x256xf32>
    %223 = tpu.matmul %222, %187, %cst_39 {dimension_numbers = #tpu.dot_dimension_numbers<[1], [0], [0], [1], [0, 0, 1, 1], [], []>} : vector<8x64xbf16>, vector<64x256xbf16>, vector<8x256xf32> -> vector<8x256xf32>
    %224 = arith.addf %221, %223 : vector<8x256xf32>
    %225 = vector.extract_strided_slice %224 {offsets = [0, 0], sizes = [8, 64], strides = [1, 1]} : vector<8x256xf32> to vector<8x64xf32>
    %226 = arith.negf %225 : vector<8x64xf32>
    %227 = math.exp %226 : vector<8x64xf32>
    %cst_40 = arith.constant 1.000000e+00 : f32
    %228 = vector.broadcast %cst_40 : f32 to vector<8x64xf32>
    %229 = arith.addf %228, %227 : vector<8x64xf32>
    %230 = arith.divf %228, %229 : vector<8x64xf32>
    %231 = vector.extract_strided_slice %224 {offsets = [0, 64], sizes = [8, 64], strides = [1, 1]} : vector<8x256xf32> to vector<8x64xf32>
    %232 = arith.negf %231 : vector<8x64xf32>
    %233 = math.exp %232 : vector<8x64xf32>
    %cst_41 = arith.constant 1.000000e+00 : f32
    %234 = vector.broadcast %cst_41 : f32 to vector<8x64xf32>
    %235 = arith.addf %234, %233 : vector<8x64xf32>
    %236 = arith.divf %234, %235 : vector<8x64xf32>
    %237 = vector.extract_strided_slice %224 {offsets = [0, 128], sizes = [8, 64], strides = [1, 1]} : vector<8x256xf32> to vector<8x64xf32>
    %238 = math.tanh %237 : vector<8x64xf32>
    %239 = vector.extract_strided_slice %224 {offsets = [0, 192], sizes = [8, 64], strides = [1, 1]} : vector<8x256xf32> to vector<8x64xf32>
    %240 = arith.negf %239 : vector<8x64xf32>
    %241 = math.exp %240 : vector<8x64xf32>
    %cst_42 = arith.constant 1.000000e+00 : f32
    %242 = vector.broadcast %cst_42 : f32 to vector<8x64xf32>
    %243 = arith.addf %242, %241 : vector<8x64xf32>
    %244 = arith.divf %242, %243 : vector<8x64xf32>
    %245 = arith.mulf %236, %217 : vector<8x64xf32>
    %246 = arith.mulf %230, %238 : vector<8x64xf32>
    %247 = arith.addf %245, %246 : vector<8x64xf32>
    %248 = math.tanh %247 : vector<8x64xf32>
    %249 = arith.mulf %244, %248 : vector<8x64xf32>
    %250 = vector.extract_strided_slice %186 {offsets = [2, 0, 0], sizes = [1, 8, 256], strides = [1, 1, 1]} : vector<4x8x256xf32> to vector<1x8x256xf32>
    %251 = vector.shape_cast %250 : vector<1x8x256xf32> to vector<8x256xf32>
    %252 = arith.truncf %249 : vector<8x64xf32> to vector<8x64xbf16>
    %cst_43 = arith.constant dense<0.000000e+00> : vector<8x256xf32>
    %253 = tpu.matmul %252, %187, %cst_43 {dimension_numbers = #tpu.dot_dimension_numbers<[1], [0], [0], [1], [0, 0, 1, 1], [], []>} : vector<8x64xbf16>, vector<64x256xbf16>, vector<8x256xf32> -> vector<8x256xf32>
    %254 = arith.addf %251, %253 : vector<8x256xf32>
    %255 = vector.extract_strided_slice %254 {offsets = [0, 0], sizes = [8, 64], strides = [1, 1]} : vector<8x256xf32> to vector<8x64xf32>
    %256 = arith.negf %255 : vector<8x64xf32>
    %257 = math.exp %256 : vector<8x64xf32>
    %cst_44 = arith.constant 1.000000e+00 : f32
    %258 = vector.broadcast %cst_44 : f32 to vector<8x64xf32>
    %259 = arith.addf %258, %257 : vector<8x64xf32>
    %260 = arith.divf %258, %259 : vector<8x64xf32>
    %261 = vector.extract_strided_slice %254 {offsets = [0, 64], sizes = [8, 64], strides = [1, 1]} : vector<8x256xf32> to vector<8x64xf32>
    %262 = arith.negf %261 : vector<8x64xf32>
    %263 = math.exp %262 : vector<8x64xf32>
    %cst_45 = arith.constant 1.000000e+00 : f32
    %264 = vector.broadcast %cst_45 : f32 to vector<8x64xf32>
    %265 = arith.addf %264, %263 : vector<8x64xf32>
    %266 = arith.divf %264, %265 : vector<8x64xf32>
    %267 = vector.extract_strided_slice %254 {offsets = [0, 128], sizes = [8, 64], strides = [1, 1]} : vector<8x256xf32> to vector<8x64xf32>
    %268 = math.tanh %267 : vector<8x64xf32>
    %269 = vector.extract_strided_slice %254 {offsets = [0, 192], sizes = [8, 64], strides = [1, 1]} : vector<8x256xf32> to vector<8x64xf32>
    %270 = arith.negf %269 : vector<8x64xf32>
    %271 = math.exp %270 : vector<8x64xf32>
    %cst_46 = arith.constant 1.000000e+00 : f32
    %272 = vector.broadcast %cst_46 : f32 to vector<8x64xf32>
    %273 = arith.addf %272, %271 : vector<8x64xf32>
    %274 = arith.divf %272, %273 : vector<8x64xf32>
    %275 = arith.mulf %266, %247 : vector<8x64xf32>
    %276 = arith.mulf %260, %268 : vector<8x64xf32>
    %277 = arith.addf %275, %276 : vector<8x64xf32>
    %278 = math.tanh %277 : vector<8x64xf32>
    %279 = arith.mulf %274, %278 : vector<8x64xf32>
    %280 = vector.extract_strided_slice %186 {offsets = [3, 0, 0], sizes = [1, 8, 256], strides = [1, 1, 1]} : vector<4x8x256xf32> to vector<1x8x256xf32>
    %281 = vector.shape_cast %280 : vector<1x8x256xf32> to vector<8x256xf32>
    %282 = arith.truncf %279 : vector<8x64xf32> to vector<8x64xbf16>
    %cst_47 = arith.constant dense<0.000000e+00> : vector<8x256xf32>
    %283 = tpu.matmul %282, %187, %cst_47 {dimension_numbers = #tpu.dot_dimension_numbers<[1], [0], [0], [1], [0, 0, 1, 1], [], []>} : vector<8x64xbf16>, vector<64x256xbf16>, vector<8x256xf32> -> vector<8x256xf32>
    %284 = arith.addf %281, %283 : vector<8x256xf32>
    %285 = vector.extract_strided_slice %284 {offsets = [0, 0], sizes = [8, 64], strides = [1, 1]} : vector<8x256xf32> to vector<8x64xf32>
    %286 = arith.negf %285 : vector<8x64xf32>
    %287 = math.exp %286 : vector<8x64xf32>
    %cst_48 = arith.constant 1.000000e+00 : f32
    %288 = vector.broadcast %cst_48 : f32 to vector<8x64xf32>
    %289 = arith.addf %288, %287 : vector<8x64xf32>
    %290 = arith.divf %288, %289 : vector<8x64xf32>
    %291 = vector.extract_strided_slice %284 {offsets = [0, 64], sizes = [8, 64], strides = [1, 1]} : vector<8x256xf32> to vector<8x64xf32>
    %292 = arith.negf %291 : vector<8x64xf32>
    %293 = math.exp %292 : vector<8x64xf32>
    %cst_49 = arith.constant 1.000000e+00 : f32
    %294 = vector.broadcast %cst_49 : f32 to vector<8x64xf32>
    %295 = arith.addf %294, %293 : vector<8x64xf32>
    %296 = arith.divf %294, %295 : vector<8x64xf32>
    %297 = vector.extract_strided_slice %284 {offsets = [0, 128], sizes = [8, 64], strides = [1, 1]} : vector<8x256xf32> to vector<8x64xf32>
    %298 = math.tanh %297 : vector<8x64xf32>
    %299 = vector.extract_strided_slice %284 {offsets = [0, 192], sizes = [8, 64], strides = [1, 1]} : vector<8x256xf32> to vector<8x64xf32>
    %300 = arith.negf %299 : vector<8x64xf32>
    %301 = math.exp %300 : vector<8x64xf32>
    %cst_50 = arith.constant 1.000000e+00 : f32
    %302 = vector.broadcast %cst_50 : f32 to vector<8x64xf32>
    %303 = arith.addf %302, %301 : vector<8x64xf32>
    %304 = arith.divf %302, %303 : vector<8x64xf32>
    %305 = arith.mulf %296, %277 : vector<8x64xf32>
    %306 = arith.mulf %290, %298 : vector<8x64xf32>
    %307 = arith.addf %305, %306 : vector<8x64xf32>
    %308 = math.tanh %307 : vector<8x64xf32>
    %309 = arith.mulf %304, %308 : vector<8x64xf32>
    %310 = vector.extract_strided_slice %219 {offsets = [0, 0], sizes = [8, 32], strides = [1, 1]} : vector<8x64xf32> to vector<8x32xf32>
    %311 = vector.extract_strided_slice %249 {offsets = [0, 0], sizes = [8, 32], strides = [1, 1]} : vector<8x64xf32> to vector<8x32xf32>
    %312 = vector.extract_strided_slice %279 {offsets = [0, 0], sizes = [8, 32], strides = [1, 1]} : vector<8x64xf32> to vector<8x32xf32>
    %313 = vector.extract_strided_slice %309 {offsets = [0, 0], sizes = [8, 32], strides = [1, 1]} : vector<8x64xf32> to vector<8x32xf32>
    %314 = vector.shape_cast %310 : vector<8x32xf32> to vector<1x8x32xf32>
    %315 = vector.shape_cast %311 : vector<8x32xf32> to vector<1x8x32xf32>
    %316 = vector.shape_cast %312 : vector<8x32xf32> to vector<1x8x32xf32>
    %317 = vector.shape_cast %313 : vector<8x32xf32> to vector<1x8x32xf32>
    %318 = tpu.concatenate %314, %315, %316, %317 in 0 : vector<1x8x32xf32>, vector<1x8x32xf32>, vector<1x8x32xf32>, vector<1x8x32xf32> -> vector<4x8x32xf32>
    %319 = vector.extract_strided_slice %309 {offsets = [0, 32], sizes = [8, 32], strides = [1, 1]} : vector<8x64xf32> to vector<8x32xf32>
    %320 = vector.extract_strided_slice %279 {offsets = [0, 32], sizes = [8, 32], strides = [1, 1]} : vector<8x64xf32> to vector<8x32xf32>
    %321 = vector.extract_strided_slice %249 {offsets = [0, 32], sizes = [8, 32], strides = [1, 1]} : vector<8x64xf32> to vector<8x32xf32>
    %322 = vector.extract_strided_slice %219 {offsets = [0, 32], sizes = [8, 32], strides = [1, 1]} : vector<8x64xf32> to vector<8x32xf32>
    %323 = vector.shape_cast %319 : vector<8x32xf32> to vector<1x8x32xf32>
    %324 = vector.shape_cast %320 : vector<8x32xf32> to vector<1x8x32xf32>
    %325 = vector.shape_cast %321 : vector<8x32xf32> to vector<1x8x32xf32>
    %326 = vector.shape_cast %322 : vector<8x32xf32> to vector<1x8x32xf32>
    %327 = tpu.concatenate %323, %324, %325, %326 in 0 : vector<1x8x32xf32>, vector<1x8x32xf32>, vector<1x8x32xf32>, vector<1x8x32xf32> -> vector<4x8x32xf32>
    %328 = tpu.concatenate %318, %327 in 2 : vector<4x8x32xf32>, vector<4x8x32xf32> -> vector<4x8x64xf32>
    %329 = vector.shape_cast %328 : vector<4x8x64xf32> to vector<32x64xf32>
    %330 = arith.truncf %329 : vector<32x64xf32> to vector<32x64xbf16>
    %c0_51 = arith.constant 0 : index
    %c0_52 = arith.constant 0 : index
    %331 = vector.load %arg7[%c0_51, %c0_52] : memref<64x64xbf16, #tpu.memory_space<vmem>>, vector<64x64xbf16>
    %cst_53 = arith.constant dense<0.000000e+00> : vector<32x64xf32>
    %332 = tpu.matmul %330, %331, %cst_53 {dimension_numbers = #tpu.dot_dimension_numbers<[1], [0], [0], [1], [0, 0, 1, 1], [], []>} : vector<32x64xbf16>, vector<64x64xbf16>, vector<32x64xf32> -> vector<32x64xf32>
    %333 = math.tanh %332 : vector<32x64xf32>
    %334 = vector.shape_cast %333 : vector<32x64xf32> to vector<4x8x64xf32>
    %c0_54 = arith.constant 0 : index
    %c0_55 = arith.constant 0 : index
    %335 = vector.load %arg8[%c0_54, %c0_55] : memref<1x64xf32, #tpu.memory_space<vmem>>, vector<1x64xf32>
    %336 = vector.shape_cast %335 : vector<1x64xf32> to vector<1x1x64xf32>
    %337 = vector.broadcast %336 : vector<1x1x64xf32> to vector<4x8x64xf32>
    %338 = arith.mulf %334, %337 : vector<4x8x64xf32>
    %cst_56 = arith.constant dense<0.000000e+00> : vector<4x8xf32>
    %339 = vector.multi_reduction <add>, %338, %cst_56 [2] : vector<4x8x64xf32> to vector<4x8xf32>
    %340 = vector.shape_cast %339 : vector<4x8xf32> to vector<4x8x1xf32>
    %cst_57 = arith.constant dense<0xFF800000> : vector<4x1xf32>
    %341 = vector.multi_reduction <maximumf>, %340, %cst_57 [1] : vector<4x8x1xf32> to vector<4x1xf32>
    %342 = vector.shape_cast %341 : vector<4x1xf32> to vector<4x1x1xf32>
    %343 = vector.broadcast %342 : vector<4x1x1xf32> to vector<4x8x1xf32>
    %344 = arith.subf %340, %343 : vector<4x8x1xf32>
    %345 = math.exp %344 : vector<4x8x1xf32>
    %cst_58 = arith.constant dense<0.000000e+00> : vector<4x1xf32>
    %346 = vector.multi_reduction <add>, %345, %cst_58 [1] : vector<4x8x1xf32> to vector<4x1xf32>
    %347 = vector.shape_cast %346 : vector<4x1xf32> to vector<4x1x1xf32>
    %348 = vector.broadcast %347 : vector<4x1x1xf32> to vector<4x8x1xf32>
    %349 = arith.divf %345, %348 : vector<4x8x1xf32>
    %350 = vector.broadcast %349 : vector<4x8x1xf32> to vector<4x8x64xf32>
    %351 = arith.mulf %328, %350 : vector<4x8x64xf32>
    %cst_59 = arith.constant dense<0.000000e+00> : vector<4x64xf32>
    %352 = vector.multi_reduction <add>, %351, %cst_59 [1] : vector<4x8x64xf32> to vector<4x64xf32>
    %353 = arith.truncf %352 : vector<4x64xf32> to vector<4x64xbf16>
    %c0_60 = arith.constant 0 : index
    %c0_61 = arith.constant 0 : index
    %354 = vector.load %arg9[%c0_60, %c0_61] : memref<64x32xbf16, #tpu.memory_space<vmem>>, vector<64x32xbf16>
    %cst_62 = arith.constant dense<0.000000e+00> : vector<4x32xf32>
    %355 = tpu.matmul %353, %354, %cst_62 {dimension_numbers = #tpu.dot_dimension_numbers<[1], [0], [0], [1], [0, 0, 1, 1], [], []>} : vector<4x64xbf16>, vector<64x32xbf16>, vector<4x32xf32> -> vector<4x32xf32>
    %c0_63 = arith.constant 0 : index
    %c0_64 = arith.constant 0 : index
    %356 = vector.load %arg10[%c0_63, %c0_64] : memref<1x32xf32, #tpu.memory_space<vmem>>, vector<1x32xf32>
    %357 = vector.broadcast %356 : vector<1x32xf32> to vector<4x32xf32>
    %358 = arith.addf %355, %357 : vector<4x32xf32>
    %359 = arith.truncf %358 : vector<4x32xf32> to vector<4x32xbf16>
    %c0_65 = arith.constant 0 : index
    %c0_66 = arith.constant 0 : index
    %360 = vector.load %arg11[%c0_65, %c0_66] : memref<32x2xbf16, #tpu.memory_space<vmem>>, vector<32x2xbf16>
    %cst_67 = arith.constant dense<0.000000e+00> : vector<4x2xf32>
    %361 = tpu.matmul %359, %360, %cst_67 {dimension_numbers = #tpu.dot_dimension_numbers<[1], [0], [0], [1], [0, 0, 1, 1], [], []>} : vector<4x32xbf16>, vector<32x2xbf16>, vector<4x2xf32> -> vector<4x2xf32>
    %c0_68 = arith.constant 0 : index
    %c0_69 = arith.constant 0 : index
    %362 = vector.load %arg12[%c0_68, %c0_69] : memref<1x2xf32, #tpu.memory_space<vmem>>, vector<1x2xf32>
    %363 = vector.broadcast %362 : vector<1x2xf32> to vector<4x2xf32>
    %364 = arith.addf %361, %363 : vector<4x2xf32>
    %c0_70 = arith.constant 0 : index
    %c0_71 = arith.constant 0 : index
    %365 = vector.load %arg13[%c0_70, %c0_71] : memref<4x2xf32, #tpu.memory_space<vmem>>, vector<4x2xf32>
    tpu.vector_store %arg13[%c0_70, %c0_71], %364 {strides = array<i32>} : memref<4x2xf32, #tpu.memory_space<vmem>>, vector<4x2xf32>,
    return
  }
}

</mosaic_0001>

<bundles_post_ra>
// kernel: lstm_attention_forward.1
= control target key start
LH: loop header
LB: loop body
LE: loop exit
PB: predicated region body
PF: predicated region fallthrough
CT: control target
= control target key end

     0   :  { %s1913_s22 = smov 32   ;;  %v1914_v45 = vmov 0   ;;  %vm65_vm0 = vcmask 261120   ;;  %vm126_vm1 = vcmask 523264   ;;  %s2558_s0 = inlined_call_operand.vmem [shape: f32[4,8,32], index: 0, kind: input, shape index: {}]   ;;  %s2559_s2 = inlined_call_operand.vmem [shape: bf16[64,256], index: 2, kind: input, shape index: {}]   ;;  %s2560_s1 = inlined_call_operand.vmem [shape: bf16[64,256], index: 1, kind: input, shape index: {}]   ;;  %s2561_s3 = inlined_call_operand.vmem [shape: f32[1,256], index: 3, kind: input, shape index: {}]   ;;  %s2562_s4 = inlined_call_operand.vmem [shape: bf16[128,256], index: 4, kind: input, shape index: {}]   ;;  %s2563_s5 = inlined_call_operand.vmem [shape: bf16[64,256], index: 5, kind: input, shape index: {}]   ;;  %s2564_s6 = inlined_call_operand.vmem [shape: f32[1,256], index: 6, kind: input, shape index: {}]   ;;  %s2565_s7 = inlined_call_operand.vmem [shape: bf16[64,64], index: 7, kind: input, shape index: {}]   ;;  %s2566_s8 = inlined_call_operand.vmem [shape: f32[1,64], index: 8, kind: input, shape index: {}]   ;;  %s2567_s10 = inlined_call_operand.vmem [shape: f32[1,32], index: 10, kind: input, shape index: {}]   ;;  %s2568_s9 = inlined_call_operand.vmem [shape: bf16[64,32], index: 9, kind: input, shape index: {}]   ;;  %s2569_s11 = inlined_call_operand.vmem [shape: bf16[32,2], index: 11, kind: input, shape index: {}]   ;;  %s2570_s12 = inlined_call_operand.vmem [shape: f32[1,2], index: 12, kind: input, shape index: {}]   ;;  %s2571_s13 = inlined_call_operand.vmem [shape: f32[4,2], index: 13, kind: output, shape index: {}]  }
   0x1   :  { %v1989_v0 = vld [vmem:[%s2558_s0 + $0x10] sm:$0xff]  ;;  %v1994_v1 = vld [vmem:[%s2558_s0 + $0x18] sm:$0xff]  ;;  %v1525_v5 = vld [vmem:[%s2559_s2 + $0x20] sm:$0xf] }
   0x2   :  { %v1533_v2 = vld [vmem:[%s2559_s2 + $0x30] sm:$0xf]  ;;  %v1760_v3 = vpack.i.bf16 %v1989_v0, %v1994_v1  ;;  %v1722_v4 = vld [vmem:[%s2559_s2 + $0x34] sm:$0xf0]  ;;  %v1720_v6 = vld [vmem:[%s2559_s2 + $0x24] sm:$0xf0] }
   0x3   :  { %v2010_v7 = vor.u32 %v1722_v4, %v1533_v2  ;;  %v1721_v8 = vld [vmem:[%s2559_s2 + $0x34] sm:$0xf]  ;;  %v1535_v9 = vld [vmem:[%s2559_s2 + $0x38] sm:$0xf0]  ;;  %v1497_v10 = vld [vmem:[%s2560_s1 + $0x30] sm:$0xf]  ;;  %v2026_v12 = vor.u32 %v1720_v6, %v1525_v5 }
   0x4   :  { %1761 = vrot.lane.b32.xlu0 %v1760_v3, %s1913_s22  ;;  %v1714_v11 = vld [vmem:[%s2560_s1 + $0x34] sm:$0xf0]  ;;  %v1517_v13 = vld [vmem:[%s2559_s2 + $0x10] sm:$0xf]  ;;  %v2031_v14 = vor.u32 %v1721_v8, %v1535_v9  ;;  %v1713_v16 = vld [vmem:[%s2560_s1 + $0x34] sm:$0xf] }
   0x5   :  { %226 = vmatpush.bf16.msra.mxu2 %v2010_v7  ;;  %v1498_v15 = vor.u32 %v1714_v11, %v1497_v10  ;;  %v1499_v17 = vld [vmem:[%s2560_s1 + $0x38] sm:$0xf0]  ;;  %v1718_v18 = vld [vmem:[%s2559_s2 + $0x14] sm:$0xf0]  ;;  %v1719_v20 = vld [vmem:[%s2559_s2 + $0x24] sm:$0xf] }
   0x6   :  { %v1502_v19 = vor.u32 %v1713_v16, %v1499_v17  ;;  %v1527_v21 = vld [vmem:[%s2559_s2 + $0x28] sm:$0xf0]  ;;  %239 = vmatpush.bf16.msra.mxu3 %v2031_v14  ;;  %v1489_v23 = vld [vmem:[%s2560_s1 + $0x20] sm:$0xf]  ;;  %v1712_v24 = vld [vmem:[%s2560_s1 + $0x24] sm:$0xf0]  ;;  %v1518_v30 = vor.u32 %v1718_v18, %v1517_v13 }
   0x7   :  { %137 = vmatpush.bf16.msra.mxu0 %v1498_v15  ;;  %v2049_v22 = vor.u32 %v1719_v20, %v1527_v21  ;;  %v1711_v25 = vld [vmem:[%s2560_s1 + $0x24] sm:$0xf]  ;;  %v1490_v26 = vor.u32 %v1712_v24, %v1489_v23  ;;  %v1491_v27 = vld [vmem:[%s2560_s1 + $0x28] sm:$0xf0]  ;;  %v1717_v28 = vld [vmem:[%s2559_s2 + $0x14] sm:$0xf] }
   0x8   :  { %156 = vmatpush.bf16.msra.mxu1 %v1502_v19  ;;  %v1519_v29 = vld [vmem:[%s2559_s2 + $0x18] sm:$0xf0]  ;;  %v1494_v31 = vor.u32 %v1711_v25, %v1491_v27  ;;  %v1481_v32 = vld [vmem:[%s2560_s1 + $0x10] sm:$0xf]  ;;  %v1710_v33 = vld [vmem:[%s2560_s1 + $0x14] sm:$0xf0] }
   0x9   :  { %227 = vmatpush.bf16.msra.mxu2 %v2026_v12  ;;  %v1709_v34 = vld [vmem:[%s2560_s1 + $0x14] sm:$0xf]  ;;  %v1509_v35 = vld [vmem:[%s2559_s2] sm:$0xf]  ;;  %v1716_v36 = vld [vmem:[%s2559_s2 + $0x4] sm:$0xf0]  ;;  %v1522_v38 = vor.u32 %v1717_v28, %v1519_v29  ;;  %v1482_v39 = vor.u32 %v1710_v33, %v1481_v32 }
   0xa   :  { %v1483_v37 = vld [vmem:[%s2560_s1 + $0x18] sm:$0xf0]  ;;  %240 = vmatpush.bf16.msra.mxu3 %v2049_v22  ;;  %v1715_v41 = vld [vmem:[%s2559_s2 + $0x4] sm:$0xf]  ;;  %v1511_v42 = vld [vmem:[%s2559_s2 + $0x8] sm:$0xf0]  ;;  %v1510_v43 = vor.u32 %v1716_v36, %v1509_v35 }
   0xb   :  { %138 = vmatpush.bf16.msra.mxu0 %v1490_v26  ;;  %v1486_v40 = vor.u32 %v1709_v34, %v1483_v37  ;;  %v1514_v44 = vor.u32 %v1715_v41, %v1511_v42  ;;  %v1473_v46 = vld [vmem:[%s2560_s1] sm:$0xf]  ;;  %v1708_v47 = vld [vmem:[%s2560_s1 + $0x4] sm:$0xf0]  ;;  %v1707_v48 = vld [vmem:[%s2560_s1 + $0x4] sm:$0xf] }
   0xc   :  { %157 = vmatpush.bf16.msra.mxu1 %v1494_v31  ;;  %v1474_v49 = vor.u32 %v1708_v47, %v1473_v46  ;;  %v1475_v50 = vld [vmem:[%s2560_s1 + $0x8] sm:$0xf0]  ;;  %v2124_v53 = vld [vmem:[%s2558_s0] sm:$0xff] }
   0xd   :  { %228 = vmatpush.bf16.msra.mxu2 %v1518_v30  ;;  %v1478_v51 = vor.u32 %v1707_v48, %v1475_v50  ;;  %v2129_v54 = vld [vmem:[%s2558_s0 + $0x8] sm:$0xff]  ;;  %v80_v2 = vld [vmem:[%s2561_s3] sm:$0x3]  ;;  %s1915_s3 = smov 64  }
   0xe   :  { %241 = vmatpush.bf16.msra.mxu3 %v1522_v38  ;;  %v2140_v3 = vperm.slane %v80_v2, 0  ;;  %v2143_v10 = vperm.slane %v80_v2, 1 }
   0xf   :  { %139 = vmatpush.bf16.msra.mxu0 %v1482_v39 }
  0x10   :  { %158 = vmatpush.bf16.msra.mxu1 %v1486_v40 }
  0x11   :  { %229 = vmatpush.bf16.msra.mxu2 %v1510_v43 }
  0x12   :  { %242 = vmatpush.bf16.msra.mxu3 %v1514_v44 }
  0x13   :  { %140 = vmatpush.bf16.msra.mxu0 %v1474_v49 }
  0x14   :  { %230 = vmatmul.bf16.vlgmr.msra.gmra.mxu2 %v1914_v45  ;;  %159 = vmatpush.bf16.msra.mxu1 %v1478_v51 }
  0x15   :  { %309 = vmatpush.bf16.msrb.mxu2 %v2010_v7  ;;  %243 = vmatmul.bf16.vlgmr.msra.gmra.mxu3 %v1914_v45 }
  0x16   :  { %322 = vmatpush.bf16.msrb.mxu3 %v2031_v14 }
  0x17   :  { %392 = vmatpush.bf16.msrb.mxu0 %v2010_v7 }
  0x18   :  { %405 = vmatpush.bf16.msrb.mxu1 %v2031_v14 }
  0x19   :  { %310 = vmatpush.bf16.msrb.mxu2 %v2026_v12 }
  0x1a   :  { %323 = vmatpush.bf16.msrb.mxu3 %v2049_v22 }
  0x1b   :  { %393 = vmatpush.bf16.msrb.mxu0 %v2026_v12 }
  0x1c   :  { %406 = vmatpush.bf16.msrb.mxu1 %v2049_v22 }
  0x1d   :  { %311 = vmatpush.bf16.msrb.mxu2 %v1518_v30 }
  0x1e   :  { %324 = vmatpush.bf16.msrb.mxu3 %v1522_v38 }
  0x1f   :  { %394 = vmatpush.bf16.msrb.mxu0 %v1518_v30 }
  0x20   :  { %407 = vmatpush.bf16.msrb.mxu1 %v1522_v38 }
  0x21   :  { %312 = vmatpush.bf16.msrb.mxu2 %v1510_v43 }
  0x22   :  { %325 = vmatpush.bf16.msrb.mxu3 %v1514_v44 }
  0x23   :  { %395 = vmatpush.bf16.msrb.mxu0 %v1510_v43 }
  0x24   :  { %408 = vmatpush.bf16.msrb.mxu1 %v1514_v44 }
  0x25   :  { %475 = vmatpush.bf16.msra.mxu2 %v2010_v7 }
  0x26   :  { %488 = vmatpush.bf16.msra.mxu3 %v2031_v14 }
  0x29   :  { %476 = vmatpush.bf16.msra.mxu2 %v2026_v12 }
  0x2a   :  { %489 = vmatpush.bf16.msra.mxu3 %v2049_v22 }
  0x2d   :  { %477 = vmatpush.bf16.msra.mxu2 %v1518_v30 }
  0x2e   :  { %490 = vmatpush.bf16.msra.mxu3 %v1522_v38 }
  0x31   :  { %478 = vmatpush.bf16.msra.mxu2 %v1510_v43 }
  0x32   :  { %491 = vmatpush.bf16.msra.mxu3 %v1514_v44 }
  0x76   :  { %v1762_v52 = vpop.permute.xlu0 %1761 }
  0x77   :  { %v1764_v55 = vunpack.i.h.bf16 %v1762_v52  ;;  %v1763_v56 = vunpack.i.l.bf16 %v1762_v52  ;;  %v1765_v52 = vpack.i.bf16 %v2124_v53, %v2129_v54 }
  0x79   :  { %v66_v57 = vsel %vm65_vm0, %v2124_v53, %v1763_v56  ;;  %v67_v58 = vsel %vm65_vm0, %v2129_v54, %v1764_v55  ;;  %1766 = vrot.lane.b32.xlu2 %v1765_v52, %s1913_s22 }
  0x7a   :  { %v70_v59 = vpack.c.bf16 %v67_v58, %v66_v57 }
  0x7c   :  { %1503 = vmatmul.msk.bf16.vlgmr.msra.gmra.mxu0 %vm126_vm1, %v70_v59  ;;  %1505 = vmatmul.msk.bf16.vlgmr.msra.gmra.mxu1 %vm126_vm1, %v70_v59 }
  0x97   :  { %v231_v60 = vpop.f32.mrf.mxu2 }
  0x98   :  { %v244_v62 = vpop.f32.mrf.mxu3 }
  0x9f   :  { %v233_v61 = vpop.f32.mrf.mxu2 }
  0xa0   :  { %v246_v63 = vpop.f32.mrf.mxu3 }
  0xf9   :  { %v142_v4 = vpop.f32.mrf.mxu0  ;;  %v161_v11 = vpop.f32.mrf.mxu1 }
  0xfa   :  { %v143_v5 = vadd.f32 %v142_v4, %v2140_v3  ;;  %v162_v12 = vadd.f32 %v161_v11, %v2143_v10 }
  0xfc   :  { %v248_v6 = vadd.f32 %v231_v60, %v143_v5  ;;  %v249_v14 = vadd.f32 %v244_v62, %v162_v12 }
  0xfe   :  { %v1539_v7 = vmul.f32 -1.442695, %v248_v6  ;;  %v1540_v26 = vmul.f32 -1.442695, %v249_v14 }
 0x100   :  { %1793 = vpow2.f32 %v1539_v7 }
 0x101   :  { %v144_v47 = vpop.f32.mrf.mxu0  ;;  %v163_v60 = vpop.f32.mrf.mxu1 }
 0x102   :  { %v145_v48 = vadd.f32 %v144_v47, %v2140_v3  ;;  %v164_v61 = vadd.f32 %v163_v60, %v2143_v10 }
 0x106   :  { %v1794_v8 = vpop.eup %1793 }
 0x107   :  { %v253_v9 = vadd.f32 1.0, %v1794_v8 }
 0x109   :  { %1795 = vrcp.f32 %v253_v9  ;;  %v265_v17 = vand.u32 2147483648, %v253_v9  ;;  %v263_v19 = vand.u32 2147483647, %v253_v9  ;;  %vm259_vm3 = vweird.f32 %v253_v9 }
 0x10a   :  { %1797 = vtanh.f32 %v249_v14 }
 0x10b   :  { %v266_v21 = vor.u32 1.1754944e-38, %v265_v17  ;;  %vm264_vm5 = vcmp.eq.f32.partialorder %v263_v19, 8.507059e+37  ;;  %1799 = vpow2.f32 %v1540_v26 }
 0x10f   :  { %v1796_v13 = vpop.eup %1795 }
 0x110   :  { %v255_v15 = vmul.f32 %v1796_v13, %v253_v9  ;;  %vm260_vm2 = vweird.f32 %v1796_v13  ;;  %v1798_v23 = vpop.eup %1797 }
 0x111   :  { %vm261_vm4 = vmor %vm259_vm3, %vm260_vm2  ;;  %v1800_v27 = vpop.eup %1799 }
 0x112   :  { %v256_v16 = vsub.f32 1.0, %v255_v15  ;;  %v273_v28 = vadd.f32 1.0, %v1800_v27 }
 0x114   :  { %v257_v18 = vmul.f32 %v1796_v13, %v256_v16  ;;  %1801 = vrcp.f32 %v273_v28  ;;  %v285_v37 = vand.u32 2147483648, %v273_v28  ;;  %vm279_vm7 = vweird.f32 %v273_v28  ;;  %v1767_v16 = vpop.permute.xlu2 %1766 }
 0x115   :  { %v283_v38 = vand.u32 2147483647, %v273_v28  ;;  %v1769_v17 = vunpack.i.h.bf16 %v1767_v16 }
 0x116   :  { %v258_v20 = vadd.f32 %v1796_v13, %v257_v18  ;;  %v286_v40 = vor.u32 1.1754944e-38, %v285_v37  ;;  %v1768_v18 = vunpack.i.l.bf16 %v1767_v16 }
 0x117   :  { %vm284_vm9 = vcmp.eq.f32.partialorder %v283_v38, 8.507059e+37 }
 0x118   :  { %v262_v22 = vsel %vm261_vm4, %v1796_v13, %v258_v20  ;;  %v68_v19 = vsel %vm65_vm0, %v1989_v0, %v1768_v18  ;;  %v69_v20 = vsel %vm65_vm0, %v1994_v1, %v1769_v17 }
 0x119   :  { %v267_v24 = vsel %vm264_vm5, %v266_v21, %v262_v22  ;;  %v71_v21 = vpack.c.bf16 %v69_v20, %v68_v19 }
 0x11a   :  { %v290_v25 = vmul.f32 %v1798_v23, %v267_v24  ;;  %v1802_v29 = vpop.eup %1801  ;;  %v289_v33 = vmul.f32 0.0, %v267_v24 }
 0x11b   :  { %v275_v30 = vmul.f32 %v1802_v29, %v273_v28  ;;  %vm280_vm6 = vweird.f32 %v1802_v29  ;;  %1504 = vmatmul.msk.bf16.gmra.mxu0 %vm126_vm1, %v71_v21  ;;  %1506 = vmatmul.msk.bf16.gmra.mxu1 %vm126_vm1, %v71_v21 }
 0x11c   :  { %292 = vrot.lane.b32.xlu0 %v290_v25, %s1915_s3  ;;  %vm281_vm8 = vmor %vm279_vm7, %vm280_vm6 }
 0x11d   :  { %v276_v31 = vsub.f32 1.0, %v275_v30 }
 0x11f   :  { %v277_v32 = vmul.f32 %v1802_v29, %v276_v31 }
 0x121   :  { %v278_v36 = vadd.f32 %v1802_v29, %v277_v32 }
 0x123   :  { %v282_v39 = vsel %vm281_vm8, %v1802_v29, %v278_v36 }
 0x124   :  { %v287_v42 = vsel %vm284_vm9, %v286_v40, %v282_v39 }
 0x18e   :  { %v293_v34 = vpop.permute.xlu0 %292 }
 0x18f   :  { %v2147_v35 = vadd.f32 %v293_v34, %v289_v33 }
 0x191   :  { %1803 = vtanh.f32 %v2147_v35 }
 0x197   :  { %v1804_v41 = vpop.eup %1803 }
 0x198   :  { %v2150_v43 = vmul.f32 %v1804_v41, %v287_v42  ;;  %v147_v37 = vpop.f32.mrf.mxu0  ;;  %v166_v38 = vpop.f32.mrf.mxu1 }
 0x199   :  { %v148_v41 = vadd.f32 %v147_v37, %v2140_v3  ;;  %v167_v52 = vadd.f32 %v166_v38, %v2143_v10 }
 0x19a   :  { %v298_v44 = vpack.c.bf16 %v2150_v43, %v2150_v43 }
 0x19c   :  { %300 = vrot.lane.b32.xlu1 %v298_v44, %s1915_s3 }
 0x1a0   :  { %v2176_v39 = vpop.f32.mrf.mxu0  ;;  %v2178_v40 = vpop.f32.mrf.mxu1 }
 0x20e   :  { %v301_v46 = vpop.permute.xlu1 %300 }
 0x20f   :  { %1541 = vmatmul.msk.bf16.vlgmr.msrb.gmra.mxu2 %vm126_vm1, %v301_v46  ;;  %1542 = vmatmul.msk.bf16.vlgmr.msrb.gmra.mxu3 %vm126_vm1, %v301_v46 }
 0x292   :  { %v314_v49 = vpop.f32.mrf.mxu2  ;;  %v327_v50 = vpop.f32.mrf.mxu3 }
 0x293   :  { %v331_v51 = vadd.f32 %v314_v49, %v145_v48  ;;  %v332_v63 = vadd.f32 %v327_v50, %v164_v61 }
 0x295   :  { %v1543_v55 = vmul.f32 -1.442695, %v331_v51  ;;  %v1544_v13 = vmul.f32 -1.442695, %v332_v63 }
 0x297   :  { %1805 = vpow2.f32 %v1543_v55 }
 0x29a   :  { %v316_v56 = vpop.f32.mrf.mxu2  ;;  %v329_v57 = vpop.f32.mrf.mxu3 }
 0x29d   :  { %v1806_v58 = vpop.eup %1805 }
 0x29e   :  { %v336_v59 = vadd.f32 1.0, %v1806_v58 }
 0x2a0   :  { %1807 = vrcp.f32 %v336_v59  ;;  %v348_v5 = vand.u32 2147483648, %v336_v59  ;;  %v346_v53 = vand.u32 2147483647, %v336_v59  ;;  %vm342_vm11 = vweird.f32 %v336_v59 }
 0x2a1   :  { %1809 = vtanh.f32 %v332_v63 }
 0x2a2   :  { %v349_v7 = vor.u32 1.1754944e-38, %v348_v5  ;;  %vm347_vm13 = vcmp.eq.f32.partialorder %v346_v53, 8.507059e+37  ;;  %1811 = vpow2.f32 %v1544_v13 }
 0x2a6   :  { %v1808_v62 = vpop.eup %1807 }
 0x2a7   :  { %v338_v2 = vmul.f32 %v1808_v62, %v336_v59  ;;  %vm343_vm10 = vweird.f32 %v1808_v62  ;;  %v1810_v9 = vpop.eup %1809 }
 0x2a8   :  { %vm344_vm12 = vmor %vm342_vm11, %vm343_vm10  ;;  %v1812_v14 = vpop.eup %1811 }
 0x2a9   :  { %v339_v4 = vsub.f32 1.0, %v338_v2  ;;  %v356_v15 = vadd.f32 1.0, %v1812_v14 }
 0x2ab   :  { %v340_v6 = vmul.f32 %v1808_v62, %v339_v4  ;;  %1813 = vrcp.f32 %v356_v15  ;;  %v368_v0 = vand.u32 2147483648, %v356_v15  ;;  %vm362_vm15 = vweird.f32 %v356_v15 }
 0x2ac   :  { %v366_v1 = vand.u32 2147483647, %v356_v15 }
 0x2ad   :  { %v341_v54 = vadd.f32 %v1808_v62, %v340_v6  ;;  %v369_v31 = vor.u32 1.1754944e-38, %v368_v0 }
 0x2ae   :  { %vm367_vm3 = vcmp.eq.f32.partialorder %v366_v1, 8.507059e+37 }
 0x2af   :  { %v345_v8 = vsel %vm344_vm12, %v1808_v62, %v341_v54 }
 0x2b0   :  { %v350_v11 = vsel %vm347_vm13, %v349_v7, %v345_v8 }
 0x2b1   :  { %v373_v12 = vmul.f32 %v1810_v9, %v350_v11  ;;  %v1814_v22 = vpop.eup %1813  ;;  %v372_v26 = vmul.f32 %v350_v11, %v2147_v35 }
 0x2b2   :  { %v358_v23 = vmul.f32 %v1814_v22, %v356_v15  ;;  %vm363_vm14 = vweird.f32 %v1814_v22 }
 0x2b3   :  { %375 = vrot.lane.b32.xlu1 %v373_v12, %s1915_s3  ;;  %vm364_vm2 = vmor %vm362_vm15, %vm363_vm14 }
 0x2b4   :  { %v359_v24 = vsub.f32 1.0, %v358_v23 }
 0x2b6   :  { %v360_v25 = vmul.f32 %v1814_v22, %v359_v24 }
 0x2b8   :  { %v361_v29 = vadd.f32 %v1814_v22, %v360_v25 }
 0x2ba   :  { %v365_v30 = vsel %vm364_vm2, %v1814_v22, %v361_v29 }
 0x2bb   :  { %v370_v33 = vsel %vm367_vm3, %v369_v31, %v365_v30 }
 0x325   :  { %v376_v27 = vpop.permute.xlu1 %375 }
 0x326   :  { %v2170_v28 = vadd.f32 %v376_v27, %v372_v26  ;;  %v150_v26 = vadd.f32 %v2176_v39, %v2140_v3 }
 0x328   :  { %1815 = vtanh.f32 %v2170_v28 }
 0x32e   :  { %v1816_v32 = vpop.eup %1815 }
 0x32f   :  { %v380_v34 = vmul.f32 %v1816_v32, %v370_v33  ;;  %v169_v33 = vadd.f32 %v2178_v40, %v2143_v10 }
 0x331   :  { %v381_v36 = vpack.c.bf16 %v380_v34, %v380_v34  ;;  %v1770_v53 = vpack.i.bf16 %v380_v34, %v2150_v43 }
 0x333   :  { %383 = vrot.lane.b32.xlu2 %v381_v36, %s1915_s3 }
 0x38d   :  { %v384_v35 = vpop.permute.xlu2 %383 }
 0x38e   :  { %1545 = vmatmul.msk.bf16.vlgmr.msrb.gmra.mxu0 %vm126_vm1, %v384_v35  ;;  %1546 = vmatmul.msk.bf16.vlgmr.msrb.gmra.mxu1 %vm126_vm1, %v384_v35 }
 0x40b   :  { %v397_v42 = vpop.f32.mrf.mxu0  ;;  %v410_v44 = vpop.f32.mrf.mxu1 }
 0x40c   :  { %v414_v46 = vadd.f32 %v397_v42, %v148_v41  ;;  %v415_v56 = vadd.f32 %v410_v44, %v167_v52 }
 0x40e   :  { %v1547_v47 = vmul.f32 -1.442695, %v414_v46  ;;  %v1548_v54 = vmul.f32 -1.442695, %v415_v56 }
 0x410   :  { %1817 = vpow2.f32 %v1547_v47 }
 0x413   :  { %v399_v48 = vpop.f32.mrf.mxu0  ;;  %v412_v49 = vpop.f32.mrf.mxu1 }
 0x416   :  { %v1818_v50 = vpop.eup %1817 }
 0x417   :  { %v419_v51 = vadd.f32 1.0, %v1818_v50 }
 0x419   :  { %1819 = vrcp.f32 %v419_v51  ;;  %v431_v59 = vand.u32 2147483648, %v419_v51  ;;  %v429_v61 = vand.u32 2147483647, %v419_v51  ;;  %vm425_vm5 = vweird.f32 %v419_v51 }
 0x41a   :  { %1821 = vtanh.f32 %v415_v56 }
 0x41b   :  { %v432_v63 = vor.u32 1.1754944e-38, %v431_v59  ;;  %vm430_vm7 = vcmp.eq.f32.partialorder %v429_v61, 8.507059e+37  ;;  %1823 = vpow2.f32 %v1548_v54  ;;  %v1738_v54 = vld [vmem:[%s2562_s4 + $0x74] sm:$0xf0] }
 0x41f   :  { %v1820_v55 = vpop.eup %1819 }
 0x420   :  { %v421_v57 = vmul.f32 %v1820_v55, %v419_v51  ;;  %vm426_vm4 = vweird.f32 %v1820_v55  ;;  %v1822_v4 = vpop.eup %1821 }
 0x421   :  { %vm427_vm6 = vmor %vm425_vm5, %vm426_vm4  ;;  %v1824_v7 = vpop.eup %1823 }
 0x422   :  { %v422_v58 = vsub.f32 1.0, %v421_v57  ;;  %v439_v8 = vadd.f32 1.0, %v1824_v7  ;;  %v1737_v7 = vld [vmem:[%s2562_s4 + $0x74] sm:$0xf] }
 0x424   :  { %v423_v60 = vmul.f32 %v1820_v55, %v422_v58  ;;  %1825 = vrcp.f32 %v439_v8  ;;  %v451_v18 = vand.u32 2147483648, %v439_v8  ;;  %vm445_vm9 = vweird.f32 %v439_v8 }
 0x425   :  { %v449_v43 = vand.u32 2147483647, %v439_v8 }
 0x426   :  { %v424_v62 = vadd.f32 %v1820_v55, %v423_v60  ;;  %v452_v20 = vor.u32 1.1754944e-38, %v451_v18  ;;  %v1746_v18 = vld [vmem:[%s2563_s5 + $0x34] sm:$0xf0] }
 0x427   :  { %vm450_vm11 = vcmp.eq.f32.partialorder %v449_v43, 8.507059e+37 }
 0x428   :  { %v428_v2 = vsel %vm427_vm6, %v1820_v55, %v424_v62 }
 0x429   :  { %v433_v5 = vsel %vm430_vm7, %v432_v63, %v428_v2 }
 0x42a   :  { %v456_v6 = vmul.f32 %v1822_v4, %v433_v5  ;;  %v1826_v9 = vpop.eup %1825  ;;  %v455_v14 = vmul.f32 %v433_v5, %v2170_v28 }
 0x42b   :  { %v441_v11 = vmul.f32 %v1826_v9, %v439_v8  ;;  %vm446_vm8 = vweird.f32 %v1826_v9 }
 0x42c   :  { %458 = vrot.lane.b32.xlu0 %v456_v6, %s1915_s3  ;;  %vm447_vm10 = vmor %vm445_vm9, %vm446_vm8 }
 0x42d   :  { %v442_v12 = vsub.f32 1.0, %v441_v11  ;;  %v1603_v11 = vld [vmem:[%s2562_s4 + $0x60] sm:$0xf] }
 0x42f   :  { %v443_v13 = vmul.f32 %v1826_v9, %v442_v12  ;;  %v1736_v12 = vld [vmem:[%s2562_s4 + $0x64] sm:$0xf0] }
 0x431   :  { %v444_v17 = vadd.f32 %v1826_v9, %v443_v13 }
 0x433   :  { %v448_v19 = vsel %vm447_vm10, %v1826_v9, %v444_v17  ;;  %v1613_v9 = vld [vmem:[%s2562_s4 + $0x78] sm:$0xf0]  ;;  %v1604_v17 = vor.u32 %v1736_v12, %v1603_v11 }
 0x434   :  { %1771 = vrot.lane.b32.xlu0 %v1770_v53, %s1915_s3  ;;  %v453_v22 = vsel %vm450_vm11, %v452_v20, %v448_v19  ;;  %v1611_v53 = vld [vmem:[%s2562_s4 + $0x70] sm:$0xf]  ;;  %v1616_v13 = vor.u32 %v1737_v7, %v1613_v9 }
 0x435   :  { %v1612_v8 = vor.u32 %v1738_v54, %v1611_v53  ;;  %v1595_v20 = vld [vmem:[%s2562_s4 + $0x50] sm:$0xf]  ;;  %v1565_v53 = vld [vmem:[%s2562_s4 + $0x18] sm:$0xf0] }
 0x436   :  { %710 = vmatpush.bf16.msra.mxu1 %v1616_v13 }
 0x437   :  { %691 = vmatpush.bf16.msra.mxu0 %v1612_v8 }
 0x43b   :  { %692 = vmatpush.bf16.msra.mxu0 %v1604_v17 }
 0x49e   :  { %v459_v15 = vpop.permute.xlu0 %458 }
 0x49f   :  { %v461_v16 = vadd.f32 %v459_v15, %v455_v14  ;;  %v1735_v14 = vld [vmem:[%s2562_s4 + $0x64] sm:$0xf]  ;;  %v1605_v15 = vld [vmem:[%s2562_s4 + $0x68] sm:$0xf0] }
 0x4a0   :  { %v1608_v43 = vor.u32 %v1735_v14, %v1605_v15 }
 0x4a1   :  { %1827 = vtanh.f32 %v461_v16 }
 0x4a2   :  { %711 = vmatpush.bf16.msra.mxu1 %v1608_v43  ;;  %v1555_v43 = vld [vmem:[%s2562_s4] sm:$0xf] }
 0x4a6   :  { %v1772_v7 = vpop.permute.xlu0 %1771 }
 0x4a7   :  { %v1828_v21 = vpop.eup %1827  ;;  %v1774_v11 = vunpack.i.h.bf16 %v1772_v7  ;;  %v1773_v12 = vunpack.i.l.bf16 %v1772_v7 }
 0x4a8   :  { %v2186_v23 = vmul.f32 %v1828_v21, %v453_v22  ;;  %v1734_v21 = vld [vmem:[%s2562_s4 + $0x54] sm:$0xf0]  ;;  %v1635_v22 = vld [vmem:[%s2563_s5 + $0x20] sm:$0xf] }
 0x4aa   :  { %v464_v24 = vpack.c.bf16 %v2186_v23, %v2186_v23 }
 0x4ac   :  { %466 = vrot.lane.b32.xlu1 %v464_v24, %s1915_s3  ;;  %v1597_v24 = vld [vmem:[%s2562_s4 + $0x58] sm:$0xf0] }
 0x51e   :  { %v467_v25 = vpop.permute.xlu1 %466 }
 0x51f   :  { %1549 = vmatmul.msk.bf16.vlgmr.msra.gmra.mxu2 %vm126_vm1, %v467_v25  ;;  %1550 = vmatmul.msk.bf16.vlgmr.msra.gmra.mxu3 %vm126_vm1, %v467_v25  ;;  %v1744_v25 = vld [vmem:[%s2563_s5 + $0x24] sm:$0xf0] }
 0x5a2   :  { %v480_v27 = vpop.f32.mrf.mxu2  ;;  %v493_v28 = vpop.f32.mrf.mxu3 }
 0x5a3   :  { %v497_v29 = vadd.f32 %v480_v27, %v150_v26  ;;  %v498_v36 = vadd.f32 %v493_v28, %v169_v33  ;;  %v2251_v26 = vor.u32 %v1744_v25, %v1635_v22  ;;  %v1627_v27 = vld [vmem:[%s2563_s5 + $0x10] sm:$0xf]  ;;  %v1596_v28 = vor.u32 %v1734_v21, %v1595_v20  ;;  %v1724_v20 = vld [vmem:[%s2562_s4 + $0x4] sm:$0xf0]  ;;  %v1723_v21 = vld [vmem:[%s2562_s4 + $0x4] sm:$0xf] }
 0x5a4   :  { %v1556_v22 = vor.u32 %v1724_v20, %v1555_v43 }
 0x5a5   :  { %v1551_v0 = vmul.f32 -1.442695, %v497_v29  ;;  %v1552_v10 = vmul.f32 -1.442695, %v498_v36  ;;  %v1742_v29 = vld [vmem:[%s2563_s5 + $0x14] sm:$0xf0]  ;;  %693 = vmatpush.bf16.msra.mxu0 %v1596_v28 }
 0x5a7   :  { %1829 = vpow2.f32 %v1551_v0  ;;  %v1745_v0 = vld [vmem:[%s2563_s5 + $0x34] sm:$0xf] }
 0x5aa   :  { %v482_v1 = vpop.f32.mrf.mxu2  ;;  %v495_v30 = vpop.f32.mrf.mxu3 }
 0x5ab   :  { %v1645_v1 = vld [vmem:[%s2563_s5 + $0x38] sm:$0xf0] }
 0x5ac   :  { %v2271_v33 = vor.u32 %v1745_v0, %v1645_v1 }
 0x5ad   :  { %v1830_v31 = vpop.eup %1829 }
 0x5ae   :  { %v502_v32 = vadd.f32 1.0, %v1830_v31  ;;  %v1587_v31 = vld [vmem:[%s2562_s4 + $0x40] sm:$0xf]  ;;  %794 = vmatpush.bf16.msrb.mxu3 %v2271_v33 }
 0x5b0   :  { %1831 = vrcp.f32 %v502_v32  ;;  %v514_v38 = vand.u32 2147483648, %v502_v32  ;;  %v512_v39 = vand.u32 2147483647, %v502_v32  ;;  %vm508_vm13 = vweird.f32 %v502_v32 }
 0x5b1   :  { %1833 = vtanh.f32 %v498_v36  ;;  %v1589_v36 = vld [vmem:[%s2562_s4 + $0x48] sm:$0xf0] }
 0x5b2   :  { %v515_v42 = vor.u32 1.1754944e-38, %v514_v38  ;;  %vm513_vm15 = vcmp.eq.f32.partialorder %v512_v39, 8.507059e+37  ;;  %1835 = vpow2.f32 %v1552_v10  ;;  %v1637_v38 = vld [vmem:[%s2563_s5 + $0x28] sm:$0xf0]  ;;  %v1579_v39 = vld [vmem:[%s2562_s4 + $0x30] sm:$0xf] }
 0x5b3   :  { %v1629_v10 = vld [vmem:[%s2563_s5 + $0x18] sm:$0xf0] }
 0x5b6   :  { %v1832_v34 = vpop.eup %1831 }
 0x5b7   :  { %v504_v35 = vmul.f32 %v1832_v34, %v502_v32  ;;  %vm509_vm12 = vweird.f32 %v1832_v34  ;;  %v1834_v46 = vpop.eup %1833  ;;  %v1732_v32 = vld [vmem:[%s2562_s4 + $0x44] sm:$0xf0] }
 0x5b8   :  { %vm510_vm14 = vmor %vm508_vm13, %vm509_vm12  ;;  %v1836_v40 = vpop.eup %1835 }
 0x5b9   :  { %v505_v37 = vsub.f32 1.0, %v504_v35  ;;  %v522_v49 = vadd.f32 1.0, %v1836_v40  ;;  %v2280_v35 = vor.u32 %v1742_v29, %v1627_v27  ;;  %v1729_v40 = vld [vmem:[%s2562_s4 + $0x34] sm:$0xf] }
 0x5bb   :  { %v506_v3 = vmul.f32 %v1832_v34, %v505_v37  ;;  %1837 = vrcp.f32 %v522_v49  ;;  %v534_v60 = vand.u32 2147483648, %v522_v49  ;;  %vm528_vm3 = vweird.f32 %v522_v49  ;;  %v1743_v37 = vld [vmem:[%s2563_s5 + $0x24] sm:$0xf] }
 0x5bc   :  { %v532_v61 = vand.u32 2147483647, %v522_v49 }
 0x5bd   :  { %v507_v41 = vadd.f32 %v1832_v34, %v506_v3  ;;  %v535_v63 = vor.u32 1.1754944e-38, %v534_v60  ;;  %v1588_v3 = vor.u32 %v1732_v32, %v1587_v31  ;;  %v1727_v60 = vld [vmem:[%s2562_s4 + $0x24] sm:$0xf]  ;;  %v605_v32 = vld [vmem:[%s2564_s6] sm:$0x3] }
 0x5be   :  { %vm533_vm5 = vcmp.eq.f32.partialorder %v532_v61, 8.507059e+37  ;;  %v1573_v61 = vld [vmem:[%s2562_s4 + $0x28] sm:$0xf0] }
 0x5bf   :  { %v511_v44 = vsel %vm510_vm14, %v1832_v34, %v507_v41  ;;  %v1731_v34 = vld [vmem:[%s2562_s4 + $0x44] sm:$0xf]  ;;  %v1619_v41 = vld [vmem:[%s2563_s5] sm:$0xf]  ;;  %694 = vmatpush.bf16.msra.mxu0 %v1588_v3 }
 0x5c0   :  { %v516_v47 = vsel %vm513_vm15, %v515_v42, %v511_v44  ;;  %v1740_v42 = vld [vmem:[%s2563_s5 + $0x4] sm:$0xf0]  ;;  %v2298_v44 = vor.u32 %v1743_v37, %v1637_v38 }
 0x5c1   :  { %v539_v48 = vmul.f32 %v1834_v46, %v516_v47  ;;  %v1838_v50 = vpop.eup %1837  ;;  %v538_v56 = vmul.f32 %v516_v47, %v461_v16  ;;  %v1643_v16 = vld [vmem:[%s2563_s5 + $0x30] sm:$0xf]  ;;  %v1592_v46 = vor.u32 %v1731_v34, %v1589_v36  ;;  %v1730_v47 = vld [vmem:[%s2562_s4 + $0x34] sm:$0xf0] }
 0x5c2   :  { %v524_v51 = vmul.f32 %v1838_v50, %v522_v49  ;;  %vm529_vm2 = vweird.f32 %v1838_v50  ;;  %v2230_v19 = vor.u32 %v1746_v18, %v1643_v16  ;;  %v1581_v49 = vld [vmem:[%s2562_s4 + $0x38] sm:$0xf0]  ;;  %795 = vmatpush.bf16.msrb.mxu3 %v2298_v44 }
 0x5c3   :  { %541 = vrot.lane.b32.xlu2 %v539_v48, %s1915_s3  ;;  %vm530_vm4 = vmor %vm528_vm3, %vm529_vm2  ;;  %v1741_v48 = vld [vmem:[%s2563_s5 + $0x14] sm:$0xf] }
 0x5c4   :  { %v525_v52 = vsub.f32 1.0, %v524_v51  ;;  %781 = vmatpush.bf16.msrb.mxu2 %v2230_v19  ;;  %v2319_v51 = vor.u32 %v1741_v48, %v1629_v10 }
 0x5c6   :  { %v526_v55 = vmul.f32 %v1838_v50, %v525_v52  ;;  %v1580_v52 = vor.u32 %v1730_v47, %v1579_v39  ;;  %796 = vmatpush.bf16.msrb.mxu3 %v2319_v51  ;;  %v2413_v39 = vperm.slane %v605_v32, 1 }
 0x5c8   :  { %v527_v59 = vadd.f32 %v1838_v50, %v526_v55  ;;  %782 = vmatpush.bf16.msrb.mxu2 %v2251_v26  ;;  %v1739_v55 = vld [vmem:[%s2563_s5 + $0x4] sm:$0xf]  ;;  %695 = vmatpush.bf16.msra.mxu0 %v1580_v52 }
 0x5ca   :  { %v531_v62 = vsel %vm530_vm4, %v1838_v50, %v527_v59  ;;  %v2316_v50 = vor.u32 %v1740_v42, %v1619_v41  ;;  %v1728_v59 = vld [vmem:[%s2562_s4 + $0x24] sm:$0xf0] }
 0x5cb   :  { %v536_v4 = vsel %vm533_vm5, %v535_v63, %v531_v62 }
 0x5cc   :  { %783 = vmatpush.bf16.msrb.mxu2 %v2280_v35 }
 0x5d0   :  { %784 = vmatpush.bf16.msrb.mxu2 %v2316_v50 }
 0x5d3   :  { %785 = vmatmul.bf16.vlgmr.msrb.gmra.mxu2 %v1914_v45 }
 0x5d4   :  { %864 = vmatpush.bf16.msra.mxu2 %v2230_v19 }
 0x5d8   :  { %865 = vmatpush.bf16.msra.mxu2 %v2251_v26 }
 0x5dc   :  { %866 = vmatpush.bf16.msra.mxu2 %v2280_v35 }
 0x5e0   :  { %867 = vmatpush.bf16.msra.mxu2 %v2316_v50 }
 0x5e4   :  { %947 = vmatpush.bf16.msrb.mxu2 %v2230_v19 }
 0x5e8   :  { %948 = vmatpush.bf16.msrb.mxu2 %v2251_v26 }
 0x5ec   :  { %949 = vmatpush.bf16.msrb.mxu2 %v2280_v35 }
 0x5f0   :  { %950 = vmatpush.bf16.msrb.mxu2 %v2316_v50 }
 0x61d   :  { %v542_v57 = vpop.permute.xlu2 %541 }
 0x61e   :  { %v544_v58 = vadd.f32 %v542_v57, %v538_v56  ;;  %v1621_v56 = vld [vmem:[%s2563_s5 + $0x8] sm:$0xf0]  ;;  %v1584_v57 = vor.u32 %v1729_v40, %v1581_v49 }
 0x61f   :  { %v1624_v62 = vor.u32 %v1739_v55, %v1621_v56 }
 0x620   :  { %1839 = vtanh.f32 %v544_v58  ;;  %v1571_v58 = vld [vmem:[%s2562_s4 + $0x20] sm:$0xf] }
 0x621   :  { %v1572_v63 = vor.u32 %v1728_v59, %v1571_v58  ;;  %797 = vmatpush.bf16.msrb.mxu3 %v1624_v62 }
 0x623   :  { %696 = vmatpush.bf16.msra.mxu0 %v1572_v63 }
 0x624   :  { %798 = vmatmul.bf16.vlgmr.msrb.gmra.mxu3 %v1914_v45 }
 0x625   :  { %877 = vmatpush.bf16.msra.mxu3 %v2271_v33 }
 0x626   :  { %v1840_v2 = vpop.eup %1839 }
 0x627   :  { %v546_v5 = vmul.f32 %v1840_v2, %v536_v4  ;;  %v1576_v2 = vor.u32 %v1727_v60, %v1573_v61  ;;  %v1563_v4 = vld [vmem:[%s2562_s4 + $0x10] sm:$0xf] }
 0x629   :  { %v1775_v6 = vpack.i.bf16 %v546_v5, %v2186_v23  ;;  %v1733_v23 = vld [vmem:[%s2562_s4 + $0x54] sm:$0xf]  ;;  %v1726_v5 = vld [vmem:[%s2562_s4 + $0x14] sm:$0xf0]  ;;  %878 = vmatpush.bf16.msra.mxu3 %v2298_v44 }
 0x62a   :  { %v1600_v30 = vor.u32 %v1733_v23, %v1597_v24  ;;  %v1564_v54 = vor.u32 %v1726_v5, %v1563_v4  ;;  %v1557_v23 = vld [vmem:[%s2562_s4 + $0x8] sm:$0xf0] }
 0x62b   :  { %1776 = vrot.lane.b32.xlu1 %v1775_v6, %s1915_s3  ;;  %v1725_v6 = vld [vmem:[%s2562_s4 + $0x14] sm:$0xf]  ;;  %v1560_v24 = vor.u32 %v1723_v21, %v1557_v23 }
 0x62c   :  { %712 = vmatpush.bf16.msra.mxu1 %v1600_v30  ;;  %v1568_v8 = vor.u32 %v1725_v6, %v1565_v53  ;;  %697 = vmatpush.bf16.msra.mxu0 %v1564_v54 }
 0x62d   :  { %879 = vmatpush.bf16.msra.mxu3 %v2319_v51 }
 0x630   :  { %713 = vmatpush.bf16.msra.mxu1 %v1592_v46  ;;  %698 = vmatpush.bf16.msra.mxu0 %v1556_v22 }
 0x631   :  { %880 = vmatpush.bf16.msra.mxu3 %v1624_v62 }
 0x634   :  { %714 = vmatpush.bf16.msra.mxu1 %v1584_v57  ;;  %1030 = vmatpush.bf16.msrb.mxu0 %v2230_v19 }
 0x635   :  { %960 = vmatpush.bf16.msrb.mxu3 %v2271_v33 }
 0x638   :  { %715 = vmatpush.bf16.msra.mxu1 %v1576_v2  ;;  %1031 = vmatpush.bf16.msrb.mxu0 %v2251_v26 }
 0x639   :  { %961 = vmatpush.bf16.msrb.mxu3 %v2298_v44 }
 0x63c   :  { %716 = vmatpush.bf16.msra.mxu1 %v1568_v8  ;;  %1032 = vmatpush.bf16.msrb.mxu0 %v2280_v35 }
 0x63d   :  { %962 = vmatpush.bf16.msrb.mxu3 %v2319_v51 }
 0x640   :  { %717 = vmatpush.bf16.msra.mxu1 %v1560_v24  ;;  %1033 = vmatpush.bf16.msrb.mxu0 %v2316_v50 }
 0x641   :  { %963 = vmatpush.bf16.msrb.mxu3 %v1624_v62 }
 0x644   :  { %1043 = vmatpush.bf16.msrb.mxu1 %v2271_v33  ;;  %v2410_v33 = vperm.slane %v605_v32, 0 }
 0x648   :  { %1044 = vmatpush.bf16.msrb.mxu1 %v2298_v44 }
 0x64c   :  { %1045 = vmatpush.bf16.msrb.mxu1 %v2319_v51 }
 0x650   :  { %1046 = vmatpush.bf16.msrb.mxu1 %v1624_v62 }
 0x656   :  { %v786_v26 = vpop.f32.mrf.mxu2 }
 0x65e   :  { %v788_v1 = vpop.f32.mrf.mxu2 }
 0x69d   :  { %v1777_v9 = vpop.permute.xlu1 %1776 }
 0x69e   :  { %v1779_v13 = vunpack.i.h.bf16 %v1777_v9  ;;  %v1778_v14 = vunpack.i.l.bf16 %v1777_v9 }
 0x6a0   :  { %v2361_v15 = vsel %vm65_vm0, %v1773_v12, %v1779_v13  ;;  %v2364_v16 = vsel %vm65_vm0, %v1774_v11, %v1778_v14  ;;  %v2367_v17 = vsel %vm65_vm0, %v1778_v14, %v1774_v11  ;;  %v2370_v45 = vsel %vm65_vm0, %v1779_v13, %v1773_v12 }
 0x6a1   :  { %v1780_v18 = vpack.i.bf16 %v2367_v17, %v2370_v45 }
 0x6a3   :  { %1781 = vrot.lane.b32.xlu2 %v1780_v18, %s1915_s3  ;;  %v1785_v18 = vpack.i.bf16 %v2361_v15, %v2364_v16 }
 0x6a7   :  { %v799_v30 = vpop.f32.mrf.mxu3 }
 0x6af   :  { %v801_v31 = vpop.f32.mrf.mxu3 }
 0x6fd   :  { %v1782_v25 = vpop.permute.xlu2 %1781 }
 0x6fe   :  { %v1784_v27 = vunpack.i.h.bf16 %v1782_v25  ;;  %v1783_v28 = vunpack.i.l.bf16 %v1782_v25 }
 0x700   :  { %v583_v29 = vsel %vm126_vm1, %v2361_v15, %v1783_v28  ;;  %v584_v19 = vsel %vm126_vm1, %v2364_v16, %v1784_v27 }
 0x701   :  { %v587_v0 = vpack.c.bf16 %v584_v19, %v583_v29 }
 0x703   :  { %699 = vmatmul.bf16.vlgmr.msra.gmra.mxu0 %v587_v0  ;;  %718 = vmatmul.bf16.vlgmr.msra.gmra.mxu1 %v587_v0 }
 0x780   :  { %v700_v34 = vpop.f32.mrf.mxu0  ;;  %v719_v41 = vpop.f32.mrf.mxu1 }
 0x781   :  { %v701_v36 = vadd.f32 %v700_v34, %v2410_v33  ;;  %v720_v42 = vadd.f32 %v719_v41, %v2413_v39 }
 0x783   :  { %v803_v35 = vadd.f32 %v786_v26, %v701_v36  ;;  %v804_v46 = vadd.f32 %v799_v30, %v720_v42 }
 0x785   :  { %v1649_v37 = vmul.f32 -1.442695, %v803_v35  ;;  %v1650_v58 = vmul.f32 -1.442695, %v804_v46 }
 0x787   :  { %1841 = vpow2.f32 %v1649_v37 }
 0x788   :  { %v702_v15 = vpop.f32.mrf.mxu0 }
 0x789   :  { %v703_v16 = vadd.f32 %v702_v15, %v2410_v33 }
 0x78d   :  { %v1842_v38 = vpop.eup %1841 }
 0x78e   :  { %v808_v3 = vadd.f32 1.0, %v1842_v38 }
 0x790   :  { %1843 = vrcp.f32 %v808_v3  ;;  %v820_v10 = vand.u32 2147483648, %v808_v3  ;;  %v818_v49 = vand.u32 2147483647, %v808_v3  ;;  %vm814_vm7 = vweird.f32 %v808_v3 }
 0x791   :  { %1845 = vtanh.f32 %v804_v46 }
 0x792   :  { %v821_v51 = vor.u32 1.1754944e-38, %v820_v10  ;;  %vm819_vm9 = vcmp.eq.f32.partialorder %v818_v49, 8.507059e+37  ;;  %1847 = vpow2.f32 %v1650_v58 }
 0x796   :  { %v1844_v44 = vpop.eup %1843 }
 0x797   :  { %v810_v47 = vmul.f32 %v1844_v44, %v808_v3  ;;  %vm815_vm6 = vweird.f32 %v1844_v44  ;;  %v1846_v55 = vpop.eup %1845 }
 0x798   :  { %vm816_vm8 = vmor %vm814_vm7, %vm815_vm6  ;;  %v1848_v59 = vpop.eup %1847 }
 0x799   :  { %v811_v48 = vsub.f32 1.0, %v810_v47  ;;  %v828_v60 = vadd.f32 1.0, %v1848_v59 }
 0x79b   :  { %v812_v40 = vmul.f32 %v1844_v44, %v811_v48  ;;  %1849 = vrcp.f32 %v828_v60  ;;  %v840_v54 = vand.u32 2147483648, %v828_v60  ;;  %vm834_vm11 = vweird.f32 %v828_v60 }
 0x79c   :  { %v838_v7 = vand.u32 2147483647, %v828_v60 }
 0x79d   :  { %v813_v50 = vadd.f32 %v1844_v44, %v812_v40  ;;  %v841_v9 = vor.u32 1.1754944e-38, %v840_v54 }
 0x79e   :  { %vm839_vm13 = vcmp.eq.f32.partialorder %v838_v7, 8.507059e+37 }
 0x79f   :  { %v817_v52 = vsel %vm816_vm8, %v1844_v44, %v813_v50 }
 0x7a0   :  { %v822_v56 = vsel %vm819_vm9, %v821_v51, %v817_v52 }
 0x7a1   :  { %v845_v57 = vmul.f32 %v1846_v55, %v822_v56  ;;  %v1850_v61 = vpop.eup %1849  ;;  %v844_v4 = vmul.f32 0.0, %v822_v56 }
 0x7a2   :  { %v830_v62 = vmul.f32 %v1850_v61, %v828_v60  ;;  %vm835_vm10 = vweird.f32 %v1850_v61 }
 0x7a3   :  { %847 = vrot.lane.b32.xlu0 %v845_v57, %s1915_s3  ;;  %vm836_vm12 = vmor %vm834_vm11, %vm835_vm10 }
 0x7a4   :  { %v831_v63 = vsub.f32 1.0, %v830_v62 }
 0x7a6   :  { %v832_v2 = vmul.f32 %v1850_v61, %v831_v63 }
 0x7a8   :  { %v833_v53 = vadd.f32 %v1850_v61, %v832_v2 }
 0x7aa   :  { %v837_v8 = vsel %vm836_vm12, %v1850_v61, %v833_v53 }
 0x7ab   :  { %v842_v12 = vsel %vm839_vm13, %v841_v9, %v837_v8 }
 0x815   :  { %v848_v5 = vpop.permute.xlu0 %847 }
 0x816   :  { %v2417_v6 = vadd.f32 %v848_v5, %v844_v4 }
 0x818   :  { %1851 = vtanh.f32 %v2417_v6 }
 0x81e   :  { %v1852_v11 = vpop.eup %1851 }
 0x81f   :  { %v2420_v13 = vmul.f32 %v1852_v11, %v842_v12 }
 0x821   :  { %v853_v14 = vpack.c.bf16 %v2420_v13, %v2420_v13 }
 0x823   :  { %855 = vrot.lane.b32.xlu1 %v853_v14, %s1915_s3 }
 0x82b   :  { %1786 = vrot.lane.b32.xlu1 %v1785_v18, %s1915_s3 }
 0x895   :  { %v856_v43 = vpop.permute.xlu1 %855 }
 0x896   :  { %1651 = vmatmul.msk.bf16.vlgmr.msra.gmra.mxu2 %vm126_vm1, %v856_v43  ;;  %1652 = vmatmul.msk.bf16.vlgmr.msra.gmra.mxu3 %vm126_vm1, %v856_v43 }
 0x89d   :  { %v1787_v20 = vpop.permute.xlu1 %1786 }
 0x89e   :  { %v1789_v21 = vunpack.i.h.bf16 %v1787_v20  ;;  %v1788_v22 = vunpack.i.l.bf16 %v1787_v20 }
 0x8a0   :  { %v585_v23 = vsel %vm126_vm1, %v2367_v17, %v1788_v22  ;;  %v586_v24 = vsel %vm126_vm1, %v2370_v45, %v1789_v21  ;;  %v721_v17 = vpop.f32.mrf.mxu1 }
 0x8a1   :  { %v588_v25 = vpack.c.bf16 %v586_v24, %v585_v23  ;;  %v722_v31 = vadd.f32 %v721_v17, %v2413_v39 }
 0x8a3   :  { %704 = vmatmul.bf16.gmra.mxu0 %v588_v25  ;;  %723 = vmatmul.bf16.gmra.mxu1 %v588_v25 }
 0x919   :  { %v869_v27 = vpop.f32.mrf.mxu2  ;;  %v882_v28 = vpop.f32.mrf.mxu3 }
 0x91a   :  { %v886_v29 = vadd.f32 %v869_v27, %v703_v16  ;;  %v887_v32 = vadd.f32 %v882_v28, %v722_v31 }
 0x91c   :  { %v1653_v19 = vmul.f32 -1.442695, %v886_v29  ;;  %v1654_v48 = vmul.f32 -1.442695, %v887_v32 }
 0x91e   :  { %1853 = vpow2.f32 %v1653_v19 }
 0x920   :  { %v705_v53 = vpop.f32.mrf.mxu0  ;;  %v724_v20 = vpop.f32.mrf.mxu1 }
 0x921   :  { %v871_v0 = vpop.f32.mrf.mxu2  ;;  %v884_v26 = vpop.f32.mrf.mxu3  ;;  %v706_v54 = vadd.f32 %v705_v53, %v2410_v33  ;;  %v725_v21 = vadd.f32 %v724_v20, %v2413_v39  ;;  %v1749_v20 = vld [vmem:[%s2565_s7 + $0x10] sm:$0xff] }
 0x924   :  { %v1854_v1 = vpop.eup %1853 }
 0x925   :  { %v891_v30 = vadd.f32 1.0, %v1854_v1 }
 0x927   :  { %1855 = vrcp.f32 %v891_v30  ;;  %v903_v35 = vand.u32 2147483648, %v891_v30  ;;  %v901_v38 = vand.u32 2147483647, %v891_v30  ;;  %vm897_vm15 = vweird.f32 %v891_v30 }
 0x928   :  { %1857 = vtanh.f32 %v887_v32 }
 0x929   :  { %v904_v41 = vor.u32 1.1754944e-38, %v903_v35  ;;  %vm902_vm3 = vcmp.eq.f32.partialorder %v901_v38, 8.507059e+37  ;;  %1859 = vpow2.f32 %v1654_v48 }
 0x92d   :  { %v1856_v45 = vpop.eup %1855 }
 0x92e   :  { %v893_v34 = vmul.f32 %v1856_v45, %v891_v30  ;;  %vm898_vm14 = vweird.f32 %v1856_v45  ;;  %v1858_v44 = vpop.eup %1857 }
 0x92f   :  { %vm899_vm2 = vmor %vm897_vm15, %vm898_vm14  ;;  %v1860_v10 = vpop.eup %1859 }
 0x930   :  { %v894_v36 = vsub.f32 1.0, %v893_v34  ;;  %v911_v40 = vadd.f32 1.0, %v1860_v10 }
 0x932   :  { %v895_v37 = vmul.f32 %v1856_v45, %v894_v36  ;;  %1861 = vrcp.f32 %v911_v40  ;;  %v923_v59 = vand.u32 2147483648, %v911_v40  ;;  %vm917_vm5 = vweird.f32 %v911_v40 }
 0x933   :  { %v921_v60 = vand.u32 2147483647, %v911_v40 }
 0x934   :  { %v896_v3 = vadd.f32 %v1856_v45, %v895_v37  ;;  %v924_v62 = vor.u32 1.1754944e-38, %v923_v59 }
 0x935   :  { %vm922_vm7 = vcmp.eq.f32.partialorder %v921_v60, 8.507059e+37 }
 0x936   :  { %v900_v42 = vsel %vm899_vm2, %v1856_v45, %v896_v3 }
 0x937   :  { %v905_v46 = vsel %vm902_vm3, %v904_v41, %v900_v42 }
 0x938   :  { %v928_v47 = vmul.f32 %v1858_v44, %v905_v46  ;;  %v1862_v49 = vpop.eup %1861  ;;  %v927_v55 = vmul.f32 %v905_v46, %v2417_v6 }
 0x939   :  { %v913_v50 = vmul.f32 %v1862_v49, %v911_v40  ;;  %vm918_vm4 = vweird.f32 %v1862_v49 }
 0x93a   :  { %930 = vrot.lane.b32.xlu2 %v928_v47, %s1915_s3  ;;  %vm919_vm6 = vmor %vm917_vm5, %vm918_vm4 }
 0x93b   :  { %v914_v51 = vsub.f32 1.0, %v913_v50  ;;  %v726_v50 = vpop.f32.mrf.mxu1 }
 0x93d   :  { %v915_v52 = vmul.f32 %v1862_v49, %v914_v51 }
 0x93f   :  { %v916_v58 = vadd.f32 %v1862_v49, %v915_v52 }
 0x941   :  { %v920_v61 = vsel %vm919_vm6, %v1862_v49, %v916_v58  ;;  %v707_v49 = vpop.f32.mrf.mxu0 }
 0x942   :  { %v925_v2 = vsel %vm922_vm7, %v924_v62, %v920_v61  ;;  %v708_v51 = vadd.f32 %v707_v49, %v2410_v33  ;;  %v727_v62 = vadd.f32 %v726_v50, %v2413_v39 }
 0x994   :  { %v931_v56 = vpop.permute.xlu2 %930 }
 0x995   :  { %v933_v57 = vadd.f32 %v931_v56, %v927_v55 }
 0x997   :  { %1863 = vtanh.f32 %v933_v57 }
 0x99d   :  { %v1864_v63 = vpop.eup %1863 }
 0x99e   :  { %v2438_v4 = vmul.f32 %v1864_v63, %v925_v2 }
 0x9a0   :  { %v936_v5 = vpack.c.bf16 %v2438_v4, %v2438_v4 }
 0x9a2   :  { %938 = vrot.lane.b32.xlu0 %v936_v5, %s1915_s3 }
 0xa14   :  { %v939_v6 = vpop.permute.xlu0 %938 }
 0xa15   :  { %1655 = vmatmul.msk.bf16.vlgmr.msrb.gmra.mxu2 %vm126_vm1, %v939_v6  ;;  %1656 = vmatmul.msk.bf16.vlgmr.msrb.gmra.mxu3 %vm126_vm1, %v939_v6 }
 0xa98   :  { %v952_v7 = vpop.f32.mrf.mxu2  ;;  %v965_v8 = vpop.f32.mrf.mxu3 }
 0xa99   :  { %v969_v9 = vadd.f32 %v952_v7, %v706_v54  ;;  %v970_v23 = vadd.f32 %v965_v8, %v725_v21  ;;  %v1748_v21 = vld [vmem:[%s2565_s7 + $0x8] sm:$0xff] }
 0xa9b   :  { %v1657_v11 = vmul.f32 -1.442695, %v969_v9  ;;  %v1658_v30 = vmul.f32 -1.442695, %v970_v23 }
 0xa9d   :  { %1865 = vpow2.f32 %v1657_v11 }
 0xaa0   :  { %v954_v12 = vpop.f32.mrf.mxu2  ;;  %v967_v14 = vpop.f32.mrf.mxu3 }
 0xaa3   :  { %v1866_v18 = vpop.eup %1865 }
 0xaa4   :  { %v974_v43 = vadd.f32 1.0, %v1866_v18 }
 0xaa6   :  { %1867 = vrcp.f32 %v974_v43  ;;  %v986_v15 = vand.u32 2147483648, %v974_v43  ;;  %v984_v27 = vand.u32 2147483647, %v974_v43  ;;  %vm980_vm9 = vweird.f32 %v974_v43 }
 0xaa7   :  { %1869 = vtanh.f32 %v970_v23 }
 0xaa8   :  { %v987_v29 = vor.u32 1.1754944e-38, %v986_v15  ;;  %vm985_vm11 = vcmp.eq.f32.partialorder %v984_v27, 8.507059e+37  ;;  %1871 = vpow2.f32 %v1658_v30 }
 0xaac   :  { %v1868_v22 = vpop.eup %1867 }
 0xaad   :  { %v976_v24 = vmul.f32 %v1868_v22, %v974_v43  ;;  %vm981_vm8 = vweird.f32 %v1868_v22  ;;  %v1870_v0 = vpop.eup %1869  ;;  %v1750_v43 = vld [vmem:[%s2565_s7 + $0x18] sm:$0xff] }
 0xaae   :  { %vm982_vm10 = vmor %vm980_vm9, %vm981_vm8  ;;  %v1872_v17 = vpop.eup %1871  ;;  %1166 = vmatpush.bf16.msra.mxu2 %v1750_v43 }
 0xaaf   :  { %v977_v25 = vsub.f32 1.0, %v976_v24  ;;  %v994_v31 = vadd.f32 1.0, %v1872_v17  ;;  %v1747_v24 = vld [vmem:[%s2565_s7] sm:$0xff] }
 0xab1   :  { %v978_v16 = vmul.f32 %v1868_v22, %v977_v25  ;;  %1873 = vrcp.f32 %v994_v31  ;;  %v1006_v41 = vand.u32 2147483648, %v994_v31  ;;  %vm1000_vm13 = vweird.f32 %v994_v31 }
 0xab2   :  { %1167 = vmatpush.bf16.msra.mxu2 %v1749_v20 }
 0xab3   :  { %v979_v28 = vadd.f32 %v1868_v22, %v978_v16  ;;  %v1007_v44 = vor.u32 1.1754944e-38, %v1006_v41 }
 0xab5   :  { %v983_v19 = vsel %vm982_vm10, %v1868_v22, %v979_v28 }
 0xab6   :  { %v988_v26 = vsel %vm985_vm11, %v987_v29, %v983_v19  ;;  %1168 = vmatpush.bf16.msra.mxu2 %v1748_v21 }
 0xab7   :  { %v1011_v1 = vmul.f32 %v1870_v0, %v988_v26  ;;  %v1874_v45 = vpop.eup %1873  ;;  %v1010_v35 = vmul.f32 %v988_v26, %v933_v57 }
 0xab8   :  { %v996_v32 = vmul.f32 %v1874_v45, %v994_v31  ;;  %vm1001_vm12 = vweird.f32 %v1874_v45 }
 0xab9   :  { %1013 = vrot.lane.b32.xlu2 %v1011_v1, %s1915_s3  ;;  %vm1002_vm14 = vmor %vm1000_vm13, %vm1001_vm12 }
 0xaba   :  { %v997_v34 = vsub.f32 1.0, %v996_v32  ;;  %1169 = vmatpush.bf16.msra.mxu2 %v1747_v24 }
 0xabc   :  { %v998_v36 = vmul.f32 %v1874_v45, %v997_v34 }
 0xabe   :  { %v999_v3 = vadd.f32 %v1874_v45, %v998_v36 }
 0xac0   :  { %v1003_v42 = vsel %vm1002_vm14, %v1874_v45, %v999_v3 }
 0xac1   :  { %1106 = vrot.lane.b32.xlu2 %v2420_v13, %s1915_s3  ;;  %v1004_v13 = vand.u32 2147483647, %v994_v31 }
 0xac3   :  { %vm1005_vm15 = vcmp.eq.f32.partialorder %v1004_v13, 8.507059e+37 }
 0xac4   :  { %v1008_v47 = vsel %vm1005_vm15, %v1007_v44, %v1003_v42  ;;  %v1790_v44 = vld [vmem:[%s2566_s8] ss:$0 sm:$0xff] }
 0xb13   :  { %v1014_v37 = vpop.permute.xlu2 %1013 }
 0xb14   :  { %v2450_v38 = vadd.f32 %v1014_v37, %v1010_v35 }
 0xb16   :  { %1875 = vtanh.f32 %v2450_v38 }
 0xb1b   :  { %v1107_v45 = vpop.permute.xlu2 %1106 }
 0xb1c   :  { %v1876_v46 = vpop.eup %1875 }
 0xb1d   :  { %v1018_v48 = vmul.f32 %v1876_v46, %v1008_v47 }
 0xb1f   :  { %v1019_v10 = vpack.c.bf16 %v1018_v48, %v1018_v48 }
 0xb21   :  { %1021 = vrot.lane.b32.xlu0 %v1019_v10, %s1915_s3 }
 0xb29   :  { %1108 = vrot.lane.b32.xlu0 %v2438_v4, %s1915_s3 }
 0xb93   :  { %v1022_v40 = vpop.permute.xlu0 %1021 }
 0xb94   :  { %1659 = vmatmul.msk.bf16.vlgmr.msrb.gmra.mxu0 %vm126_vm1, %v1022_v40  ;;  %1660 = vmatmul.msk.bf16.vlgmr.msrb.gmra.mxu1 %vm126_vm1, %v1022_v40 }
 0xb9b   :  { %v1109_v34 = vpop.permute.xlu0 %1108 }
 0xc11   :  { %v1035_v52 = vpop.f32.mrf.mxu0  ;;  %v1048_v55 = vpop.f32.mrf.mxu1 }
 0xc12   :  { %v1052_v56 = vadd.f32 %v1035_v52, %v708_v51  ;;  %v1053_v2 = vadd.f32 %v1048_v55, %v727_v62 }
 0xc14   :  { %v1661_v57 = vmul.f32 -1.442695, %v1052_v56  ;;  %v1662_v39 = vmul.f32 -1.442695, %v1053_v2 }
 0xc16   :  { %1877 = vpow2.f32 %v1661_v57 }
 0xc19   :  { %v1037_v58 = vpop.f32.mrf.mxu0  ;;  %v1050_v59 = vpop.f32.mrf.mxu1 }
 0xc1c   :  { %v1878_v60 = vpop.eup %1877 }
 0xc1d   :  { %v1057_v61 = vadd.f32 1.0, %v1878_v60 }
 0xc1f   :  { %1879 = vrcp.f32 %v1057_v61  ;;  %v1069_v6 = vand.u32 2147483648, %v1057_v61  ;;  %v1067_v33 = vand.u32 2147483647, %v1057_v61  ;;  %vm1063_vm3 = vweird.f32 %v1057_v61 }
 0xc20   :  { %1881 = vtanh.f32 %v1053_v2 }
 0xc21   :  { %v1070_v7 = vor.u32 1.1754944e-38, %v1069_v6  ;;  %vm1068_vm5 = vcmp.eq.f32.partialorder %v1067_v33, 8.507059e+37  ;;  %1883 = vpow2.f32 %v1662_v39 }
 0xc25   :  { %v1880_v63 = vpop.eup %1879 }
 0xc26   :  { %v1059_v4 = vmul.f32 %v1880_v63, %v1057_v61  ;;  %vm1064_vm2 = vweird.f32 %v1880_v63  ;;  %v1882_v9 = vpop.eup %1881 }
 0xc27   :  { %vm1065_vm4 = vmor %vm1063_vm3, %vm1064_vm2  ;;  %v1884_v14 = vpop.eup %1883 }
 0xc28   :  { %v1060_v5 = vsub.f32 1.0, %v1059_v4  ;;  %v1077_v18 = vadd.f32 1.0, %v1884_v14 }
 0xc2a   :  { %v1061_v53 = vmul.f32 %v1880_v63, %v1060_v5  ;;  %1885 = vrcp.f32 %v1077_v18  ;;  %v1089_v19 = vand.u32 2147483648, %v1077_v18  ;;  %vm1083_vm7 = vweird.f32 %v1077_v18 }
 0xc2b   :  { %v1087_v0 = vand.u32 2147483647, %v1077_v18 }
 0xc2c   :  { %v1062_v54 = vadd.f32 %v1880_v63, %v1061_v53  ;;  %v1090_v1 = vor.u32 1.1754944e-38, %v1089_v19 }
 0xc2d   :  { %vm1088_vm9 = vcmp.eq.f32.partialorder %v1087_v0, 8.507059e+37 }
 0xc2e   :  { %v1066_v8 = vsel %vm1065_vm4, %v1880_v63, %v1062_v54 }
 0xc2f   :  { %v1071_v11 = vsel %vm1068_vm5, %v1070_v7, %v1066_v8 }
 0xc30   :  { %v1094_v12 = vmul.f32 %v1882_v9, %v1071_v11  ;;  %v1886_v22 = vpop.eup %1885  ;;  %v1093_v16 = vmul.f32 %v1071_v11, %v2450_v38 }
 0xc31   :  { %v1079_v23 = vmul.f32 %v1886_v22, %v1077_v18  ;;  %vm1084_vm6 = vweird.f32 %v1886_v22 }
 0xc32   :  { %1096 = vrot.lane.b32.xlu1 %v1094_v12, %s1915_s3  ;;  %vm1085_vm8 = vmor %vm1083_vm7, %vm1084_vm6 }
 0xc33   :  { %v1080_v25 = vsub.f32 1.0, %v1079_v23 }
 0xc35   :  { %v1081_v15 = vmul.f32 %v1886_v22, %v1080_v25 }
 0xc37   :  { %v1082_v29 = vadd.f32 %v1886_v22, %v1081_v15 }
 0xc39   :  { %v1086_v26 = vsel %vm1085_vm8, %v1886_v22, %v1082_v29 }
 0xc3a   :  { %1110 = vrot.lane.b32.xlu1 %v1018_v48, %s1915_s3  ;;  %v1091_v17 = vsel %vm1088_vm9, %v1090_v1, %v1086_v26 }
 0xca4   :  { %v1097_v27 = vpop.permute.xlu1 %1096 }
 0xca5   :  { %v1099_v28 = vadd.f32 %v1097_v27, %v1093_v16 }
 0xca7   :  { %1887 = vtanh.f32 %v1099_v28 }
 0xcac   :  { %v1111_v32 = vpop.permute.xlu1 %1110 }
 0xcad   :  { %v1888_v30 = vpop.eup %1887  ;;  %v2477_v35 = vsel %vm65_vm0, %v1109_v34, %v1111_v32  ;;  %v2489_v41 = vsel %vm65_vm0, %v1111_v32, %v1109_v34 }
 0xcae   :  { %v1101_v31 = vmul.f32 %v1888_v30, %v1091_v17 }
 0xcb0   :  { %1112 = vrot.lane.b32.xlu2 %v1101_v31, %s1915_s3 }
 0xd0a   :  { %v1113_v36 = vpop.permute.xlu2 %1112 }
 0xd0b   :  { %v2480_v37 = vsel %vm65_vm0, %v1107_v45, %v1113_v36  ;;  %v2486_v3 = vsel %vm65_vm0, %v1113_v36, %v1107_v45 }
 0xd0c   :  { %v1122_v38 = vpack.c.bf16 %v2477_v35, %v2480_v37  ;;  %v1123_v13 = vpack.c.bf16 %v2486_v3, %v2489_v41 }
 0xd0e   :  { %1679 = vmatmul.msk.bf16.vlgmr.msra.gmra.mxu2 %vm126_vm1, %v1122_v38 }
 0xd1e   :  { %1680 = vmatmul.msk.bf16.gmra.mxu2 %vm126_vm1, %v1123_v13 }
 0xd91   :  { %v1171_v42 = vpop.f32.mrf.mxu2 }
 0xd92   :  { %1889 = vtanh.f32 %v1171_v42 }
 0xd98   :  { %v1890_v46 = vpop.eup %1889 }
 0xd99   :  { %v1173_v47 = vpop.f32.mrf.mxu2  ;;  %v1189_v48 = vmul.f32 %v1890_v46, %v1790_v44 }
 0xd9a   :  { %1891 = vtanh.f32 %v1173_v47 }
 0xd9b   :  { %v1193_v10 = vsel %vm126_vm1, %v1189_v48, 0.0 }
 0xd9c   :  { %1194 = vadd.xlane.f32.xlu0 %v1193_v10 }
 0xda0   :  { %v1892_v40 = vpop.eup %1891 }
 0xda1   :  { %v1176_v49 = vpop.f32.mrf.mxu2  ;;  %v1190_v50 = vmul.f32 %v1892_v40, %v1790_v44 }
 0xda2   :  { %1893 = vtanh.f32 %v1176_v49 }
 0xda3   :  { %v1196_v51 = vsel %vm126_vm1, %v1190_v50, 0.0 }
 0xda4   :  { %1197 = vadd.xlane.f32.xlu1 %v1196_v51 }
 0xda8   :  { %v1894_v52 = vpop.eup %1893 }
 0xda9   :  { %v1178_v55 = vpop.f32.mrf.mxu2  ;;  %v1191_v56 = vmul.f32 %v1894_v52, %v1790_v44 }
 0xdaa   :  { %1895 = vtanh.f32 %v1178_v55 }
 0xdab   :  { %v1199_v57 = vsel %vm126_vm1, %v1191_v56, 0.0 }
 0xdac   :  { %1200 = vadd.xlane.f32.xlu2 %v1199_v57 }
 0xdb0   :  { %v1896_v58 = vpop.eup %1895 }
 0xdb1   :  { %v1192_v59 = vmul.f32 %v1896_v58, %v1790_v44 }
 0xdb3   :  { %v1202_v60 = vsel %vm126_vm1, %v1192_v59, 0.0 }
 0xdb4   :  { %1203 = vadd.xlane.f32.xlu2 %v1202_v60 }
 0xe0f   :  { %v1195_v61 = vpop.xlane.xlu0 %1194 }
 0xe10   :  { %v1205_v62 = vrot.slane %v1195_v61, 4 }
 0xe12   :  { %v1206_v63 = vmax.f32 %v1195_v61, %v1205_v62 }
 0xe14   :  { %v1207_v2 = vrot.slane %v1206_v63, 2 }
 0xe16   :  { %v1208_v4 = vmax.f32 %v1206_v63, %v1207_v2 }
 0xe17   :  { %v1198_v5 = vpop.xlane.xlu1 %1197 }
 0xe18   :  { %v1209_v6 = vrot.slane %v1208_v4, 1  ;;  %v1211_v53 = vrot.slane %v1198_v5, 4 }
 0xe1a   :  { %v1210_v33 = vmax.f32 %v1208_v4, %v1209_v6  ;;  %v1212_v54 = vmax.f32 %v1198_v5, %v1211_v53 }
 0xe1c   :  { %v1229_v7 = vsub.f32 %v1195_v61, %v1210_v33  ;;  %v1213_v8 = vrot.slane %v1212_v54, 2 }
 0xe1e   :  { %v1233_v9 = vmul.f32 1.442695, %v1229_v7  ;;  %v1214_v11 = vmax.f32 %v1212_v54, %v1213_v8  ;;  %v1754_v8 = vld [vmem:[%s2568_s9 + $0x18] sm:$0xff] }
 0xe1f   :  { %v1201_v12 = vpop.xlane.xlu2 %1200  ;;  %1419 = vmatpush.bf16.msra.mxu3 %v1754_v8 }
 0xe20   :  { %1897 = vpow2.f32 %v1233_v9  ;;  %v1215_v39 = vrot.slane %v1214_v11, 1  ;;  %v1217_v14 = vrot.slane %v1201_v12, 4 }
 0xe22   :  { %v1216_v18 = vmax.f32 %v1214_v11, %v1215_v39  ;;  %v1218_v43 = vmax.f32 %v1201_v12, %v1217_v14  ;;  %v1753_v39 = vld [vmem:[%s2568_s9 + $0x10] sm:$0xff] }
 0xe23   :  { %1420 = vmatpush.bf16.msra.mxu3 %v1753_v39 }
 0xe24   :  { %v1230_v20 = vsub.f32 %v1198_v5, %v1216_v18  ;;  %v1219_v21 = vrot.slane %v1218_v43, 2 }
 0xe26   :  { %v2501_v22 = vpop.eup %1897  ;;  %v1235_v23 = vmul.f32 1.442695, %v1230_v20  ;;  %v1220_v24 = vmax.f32 %v1218_v43, %v1219_v21 }
 0xe27   :  { %v1241_v25 = vrot.slane %v2501_v22, 4  ;;  %v1204_v15 = vpop.xlane.xlu2 %1203 }
 0xe28   :  { %1899 = vpow2.f32 %v1235_v23  ;;  %v1221_v16 = vrot.slane %v1220_v24, 1  ;;  %v1223_v27 = vrot.slane %v1204_v15, 4 }
 0xe29   :  { %v1242_v28 = vadd.f32 %v2501_v22, %v1241_v25 }
 0xe2a   :  { %v1222_v29 = vmax.f32 %v1220_v24, %v1221_v16  ;;  %v1224_v19 = vmax.f32 %v1204_v15, %v1223_v27 }
 0xe2b   :  { %v1243_v0 = vrot.slane %v1242_v28, 2 }
 0xe2c   :  { %v1231_v26 = vsub.f32 %v1201_v12, %v1222_v29  ;;  %v1225_v1 = vrot.slane %v1224_v19, 2 }
 0xe2d   :  { %v1244_v30 = vadd.f32 %v1243_v0, %v1242_v28 }
 0xe2e   :  { %v2505_v17 = vpop.eup %1899  ;;  %v1237_v31 = vmul.f32 1.442695, %v1231_v26  ;;  %v1226_v45 = vmax.f32 %v1224_v19, %v1225_v1 }
 0xe2f   :  { %v1245_v32 = vrot.slane %v1244_v30, 1  ;;  %v1247_v34 = vrot.slane %v2505_v17, 4 }
 0xe30   :  { %1901 = vpow2.f32 %v1237_v31  ;;  %v1227_v36 = vrot.slane %v1226_v45, 1 }
 0xe31   :  { %v1246_v38 = vadd.f32 %v1245_v32, %v1244_v30  ;;  %v1248_v13 = vadd.f32 %v2505_v17, %v1247_v34  ;;  %v1751_v30 = vld [vmem:[%s2568_s9] sm:$0xff] }
 0xe32   :  { %v1228_v42 = vmax.f32 %v1226_v45, %v1227_v36 }
 0xe33   :  { %1903 = vrcp.f32 %v1246_v38  ;;  %v1249_v44 = vrot.slane %v1248_v13, 2  ;;  %v1276_v61 = vand.u32 2147483648, %v1246_v38  ;;  %vm1270_vm11 = vweird.f32 %v1246_v38 }
 0xe34   :  { %v1232_v46 = vsub.f32 %v1204_v15, %v1228_v42  ;;  %v1274_v4 = vand.u32 2147483647, %v1246_v38  ;;  %v1752_v15 = vld [vmem:[%s2568_s9 + $0x8] sm:$0xff] }
 0xe35   :  { %v1250_v48 = vadd.f32 %v1249_v44, %v1248_v13  ;;  %v1277_v54 = vor.u32 1.1754944e-38, %v1276_v61  ;;  %1421 = vmatpush.bf16.msra.mxu3 %v1752_v15 }
 0xe36   :  { %v2509_v47 = vpop.eup %1901  ;;  %v1239_v10 = vmul.f32 1.442695, %v1232_v46  ;;  %vm1275_vm13 = vcmp.eq.f32.partialorder %v1274_v4, 8.507059e+37 }
 0xe37   :  { %v1253_v40 = vrot.slane %v2509_v47, 4  ;;  %v1251_v49 = vrot.slane %v1250_v48, 1 }
 0xe38   :  { %1905 = vpow2.f32 %v1239_v10 }
 0xe39   :  { %v1904_v50 = vpop.eup %1903  ;;  %v1254_v51 = vadd.f32 %v2509_v47, %v1253_v40  ;;  %v1252_v55 = vadd.f32 %v1251_v49, %v1250_v48  ;;  %1422 = vmatpush.bf16.msra.mxu3 %v1751_v30  ;;  %v1791_v30 = vld [vmem:[%s2567_s10] ss:$0 sm:$0xff] }
 0xe3a   :  { %v1266_v52 = vmul.f32 %v1904_v50, %v1246_v38  ;;  %vm1271_vm10 = vweird.f32 %v1904_v50 }
 0xe3b   :  { %v1255_v56 = vrot.slane %v1254_v51, 2  ;;  %1907 = vrcp.f32 %v1252_v55  ;;  %vm1272_vm12 = vmor %vm1270_vm11, %vm1271_vm10  ;;  %v1291_v14 = vand.u32 2147483648, %v1252_v55  ;;  %v1289_v43 = vand.u32 2147483647, %v1252_v55 }
 0xe3c   :  { %v1267_v57 = vsub.f32 1.0, %v1266_v52  ;;  %vm1285_vm15 = vweird.f32 %v1252_v55 }
 0xe3d   :  { %v1256_v58 = vadd.f32 %v1255_v56, %v1254_v51  ;;  %v1292_v16 = vor.u32 1.1754944e-38, %v1291_v14  ;;  %vm1290_vm3 = vcmp.eq.f32.partialorder %v1289_v43, 8.507059e+37 }
 0xe3e   :  { %v2513_v59 = vpop.eup %1905  ;;  %v1268_v60 = vmul.f32 %v1904_v50, %v1267_v57 }
 0xe3f   :  { %v1257_v62 = vrot.slane %v1256_v58, 1  ;;  %v1259_v63 = vrot.slane %v2513_v59, 4 }
 0xe40   :  { %v1269_v2 = vadd.f32 %v1904_v50, %v1268_v60 }
 0xe41   :  { %v1258_v5 = vadd.f32 %v1257_v62, %v1256_v58  ;;  %v1260_v6 = vadd.f32 %v2513_v59, %v1259_v63  ;;  %v1908_v53 = vpop.eup %1907 }
 0xe42   :  { %v1273_v33 = vsel %vm1272_vm12, %v1904_v50, %v1269_v2  ;;  %v1281_v7 = vmul.f32 %v1908_v53, %v1252_v55  ;;  %vm1286_vm14 = vweird.f32 %v1908_v53  ;;  %v1756_v50 = vld [vmem:[%s2569_s11 + $0x8] sm:$0xff]  ;;  %vm1381_vm12 = vcmask 1041409  }
 0xe43   :  { %1909 = vrcp.f32 %v1258_v5  ;;  %v1278_v9 = vsel %vm1275_vm13, %v1277_v54, %v1273_v33  ;;  %v1261_v12 = vrot.slane %v1260_v6, 2  ;;  %vm1287_vm2 = vmor %vm1285_vm15, %vm1286_vm14  ;;  %v1306_v1 = vand.u32 2147483648, %v1258_v5  ;;  %1458 = vmatpush.bf16.msra.mxu0 %v1756_v50 }
 0xe44   :  { %v1282_v11 = vsub.f32 1.0, %v1281_v7  ;;  %v1279_v21 = vmul.f32 %v2501_v22, %v1278_v9  ;;  %v1304_v45 = vand.u32 2147483647, %v1258_v5  ;;  %vm1300_vm5 = vweird.f32 %v1258_v5 }
 0xe45   :  { %v1262_v20 = vadd.f32 %v1261_v12, %v1260_v6  ;;  %vm1383_vm13 = vcmask 1042434   ;;  %vm1385_vm14 = vcmask 1043459   ;;  %vm1465_vm15 = vcmask 11264  }
 0xe46   :  { %v1283_v18 = vmul.f32 %v1908_v53, %v1282_v11  ;;  %v1325_v19 = vmul.f32 %v1279_v21, %v2480_v37  ;;  %vm1305_vm7 = vcmp.eq.f32.partialorder %v1304_v45, 8.507059e+37 }
 0xe47   :  { %v1263_v25 = vrot.slane %v1262_v20, 1 }
 0xe48   :  { %v1284_v24 = vadd.f32 %v1908_v53, %v1283_v18  ;;  %v1329_v34 = vsel %vm126_vm1, %v1325_v19, 0.0 }
 0xe49   :  { %v1910_v23 = vpop.eup %1909  ;;  %v1264_v29 = vadd.f32 %v1263_v25, %v1262_v20  ;;  %v1330_v44 = vrot.slane %v1329_v34, 4 }
 0xe4a   :  { %v1296_v27 = vmul.f32 %v1910_v23, %v1258_v5  ;;  %v1288_v28 = vsel %vm1287_vm2, %v1908_v53, %v1284_v24  ;;  %vm1301_vm4 = vweird.f32 %v1910_v23 }
 0xe4b   :  { %v1293_v0 = vsel %vm1290_vm3, %v1292_v16, %v1288_v28  ;;  %1911 = vrcp.f32 %v1264_v29  ;;  %vm1302_vm6 = vmor %vm1300_vm5, %vm1301_vm4  ;;  %v1331_v51 = vadd.f32 %v1330_v44, %v1329_v34  ;;  %v1321_v52 = vand.u32 2147483648, %v1264_v29 }
 0xe4c   :  { %v1297_v26 = vsub.f32 1.0, %v1296_v27  ;;  %v1294_v22 = vmul.f32 %v2505_v17, %v1293_v0  ;;  %v1307_v17 = vor.u32 1.1754944e-38, %v1306_v1  ;;  %v1319_v57 = vand.u32 2147483647, %v1264_v29 }
 0xe4d   :  { %vm1315_vm9 = vweird.f32 %v1264_v29  ;;  %v1332_v61 = vrot.slane %v1331_v51, 2  ;;  %v1322_v62 = vor.u32 1.1754944e-38, %v1321_v52 }
 0xe4e   :  { %v1298_v31 = vmul.f32 %v1910_v23, %v1297_v26  ;;  %v1326_v32 = vmul.f32 %v1294_v22, %v2477_v35  ;;  %vm1320_vm11 = vcmp.eq.f32.partialorder %v1319_v57, 8.507059e+37 }
 0xe4f   :  { %v1333_v33 = vadd.f32 %v1332_v61, %v1331_v51 }
 0xe50   :  { %v1299_v36 = vadd.f32 %v1910_v23, %v1298_v31  ;;  %v1336_v37 = vsel %vm126_vm1, %v1326_v32, 0.0 }
 0xe51   :  { %v1337_v38 = vrot.slane %v1336_v37, 4  ;;  %v1912_v42 = vpop.eup %1911  ;;  %v1334_v39 = vrot.slane %v1333_v33, 1 }
 0xe52   :  { %v1303_v13 = vsel %vm1302_vm6, %v1910_v23, %v1299_v36  ;;  %v1311_v10 = vmul.f32 %v1912_v42, %v1264_v29  ;;  %vm1316_vm8 = vweird.f32 %v1912_v42  ;;  %v1792_v36 = vld [vmem:[%s2570_s12] ss:$0 sm:$0xff] }
 0xe53   :  { %v1308_v46 = vsel %vm1305_vm7, %v1307_v17, %v1303_v13  ;;  %v1338_v40 = vadd.f32 %v1337_v38, %v1336_v37  ;;  %vm1317_vm10 = vmor %vm1315_vm9, %vm1316_vm8  ;;  %v1335_v20 = vadd.f32 %v1334_v39, %v1333_v33 }
 0xe54   :  { %v1309_v48 = vmul.f32 %v2509_v47, %v1308_v46  ;;  %v1312_v49 = vsub.f32 1.0, %v1311_v10  ;;  %v1755_v47 = vld [vmem:[%s2569_s11] sm:$0xff] }
 0xe55   :  { %v1339_v58 = vrot.slane %v1338_v40, 2  ;;  %1459 = vmatpush.bf16.msra.mxu0 %v1755_v47 }
 0xe56   :  { %v1327_v35 = vmul.f32 %v1309_v48, %v2489_v41  ;;  %v1313_v56 = vmul.f32 %v1912_v42, %v1312_v49 }
 0xe57   :  { %v1340_v5 = vadd.f32 %v1339_v58, %v1338_v40 }
 0xe58   :  { %v1343_v55 = vsel %vm126_vm1, %v1327_v35, 0.0  ;;  %v1314_v41 = vadd.f32 %v1912_v42, %v1313_v56 }
 0xe59   :  { %v1344_v60 = vrot.slane %v1343_v55, 4  ;;  %v1341_v8 = vrot.slane %v1340_v5, 1 }
 0xe5a   :  { %v1318_v2 = vsel %vm1317_vm10, %v1912_v42, %v1314_v41 }
 0xe5b   :  { %v1345_v63 = vadd.f32 %v1344_v60, %v1343_v55  ;;  %v1323_v4 = vsel %vm1320_vm11, %v1322_v62, %v1318_v2  ;;  %v1342_v14 = vadd.f32 %v1341_v8, %v1340_v5 }
 0xe5c   :  { %v1324_v53 = vmul.f32 %v2513_v59, %v1323_v4  ;;  %v1357_v59 = vpack.c.bf16 %v1335_v20, %v1335_v20 }
 0xe5d   :  { %v1346_v6 = vrot.slane %v1345_v63, 2  ;;  %v1358_v24 = vpack.c.bf16 %v1342_v14, %v1342_v14 }
 0xe5e   :  { %v1328_v7 = vmul.f32 %v1324_v53, %v2486_v3  ;;  %v1377_v29 = vunpack.c.l.b16 %v1357_v59 }
 0xe5f   :  { %v1347_v54 = vadd.f32 %v1346_v6, %v1345_v63  ;;  %v1378_v27 = vunpack.c.l.b16 %v1358_v24 }
 0xe60   :  { %v1350_v9 = vsel %vm126_vm1, %v1328_v7, 0.0 }
 0xe61   :  { %v1348_v11 = vrot.slane %v1347_v54, 1  ;;  %v1351_v12 = vrot.slane %v1350_v9, 4  ;;  %v1382_v0 = vsel %vm1381_vm12, %v1378_v27, %v1377_v29 }
 0xe63   :  { %v1352_v18 = vadd.f32 %v1351_v12, %v1350_v9  ;;  %v1349_v43 = vadd.f32 %v1348_v11, %v1347_v54 }
 0xe65   :  { %v1353_v21 = vrot.slane %v1352_v18, 2  ;;  %v1359_v25 = vpack.c.bf16 %v1349_v43, %v1349_v43 }
 0xe67   :  { %v1354_v23 = vadd.f32 %v1353_v21, %v1352_v18  ;;  %v1379_v28 = vunpack.c.l.b16 %v1359_v25 }
 0xe69   :  { %v1355_v15 = vrot.slane %v1354_v23, 1  ;;  %v1384_v26 = vsel %vm1383_vm13, %v1379_v28, %v1382_v0 }
 0xe6b   :  { %v1356_v16 = vadd.f32 %v1355_v15, %v1354_v23 }
 0xe6d   :  { %v1360_v3 = vpack.c.bf16 %v1356_v16, %v1356_v16 }
 0xe6f   :  { %v1380_v19 = vunpack.c.l.b16 %v1360_v3 }
 0xe71   :  { %v1386_v22 = vsel %vm1385_vm14, %v1380_v19, %v1384_v26 }
 0xe72   :  { %v1387_v1 = vpack.c.b16 %v1386_v22, %v1386_v22 }
 0xe74   :  { %1697 = vmatmul.msk.bf16.vlgmr.msra.gmra.mxu3 %vm126_vm1, %v1387_v1 }
 0xef7   :  { %v1424_v31 = vpop.f32.mrf.mxu3 }
 0xef8   :  { %v1425_v45 = vadd.f32 %v1791_v30, %v1424_v31 }
 0xefa   :  { %v1428_v32 = vpack.c.bf16 %v1425_v45, %v1425_v45 }
 0xefc   :  { %1706 = vmatmul.msk.bf16.vlgmr.msra.gmra.mxu0 %vm65_vm0, %v1428_v32 }
 0xeff   :  { %v1426_v34 = vpop.f32.mrf.mxu3 }
 0xf79   :  { %v1461_v37 = vpop.f32.mrf.mxu0 }
 0xf7a   :  { %v1462_v17 = vadd.f32 %v1792_v36, %v1461_v37 }
 0xf7c   :  { %1466 = vst.msk [vmem:[%s2571_s13] sm:$0xf] %vm1465_vm15, %v1462_v17 }
 0xf81   :  { %v1463_v38 = vpop.f32.mrf.mxu0 }

</bundles_post_ra>
